<compile_context>
chip_gen: v5e
topology: v5e:2x2
jax: 0.10.0
libtpu: 0.0.40
codegen_flags: <defaults>
</compile_context>

<pallas_src>
import functools

import numpy as np
import jax
import jax.numpy as jnp
from jax.experimental import pallas as pl
from jax.experimental.pallas import tpu as pltpu

PRIMITIVES = [
    'none', 'max_pool_3x3', 'avg_pool_3x3', 'skip_connect',
    'sep_conv_3x3', 'sep_conv_5x5', 'dil_conv_3x3', 'dil_conv_5x5',
]

_SEP_CFG = {'sep_conv_3x3': (3, 1), 'sep_conv_5x5': (5, 2)}          # (K, pad), dilation 1
_DIL_CFG = {'dil_conv_3x3': (3, 2, 2), 'dil_conv_5x5': (5, 4, 2)}    # (K, pad, dilation)

BN_EPS = 1e-5


# ----------------------------- in-kernel helpers -----------------------------

def _bn_norm(y):
    """Training-mode BatchNorm (batch stats, biased var, gamma=1/beta=0) over all leading
    axes of `y` (channels last).  Traced math used inside kernel bodies only."""
    inv_m = 1.0
    for d in y.shape[:-1]:
        inv_m /= d
    s = y
    for ax in range(y.ndim - 1):
        s = jnp.sum(s, axis=ax, keepdims=True)
    mean = s * inv_m
    yc = y - mean
    s2 = yc * yc
    for ax in range(y.ndim - 1):
        s2 = jnp.sum(s2, axis=ax, keepdims=True)
    var = s2 * inv_m
    return yc * jax.lax.rsqrt(var + BN_EPS)


# ----------------------------- Pallas kernels -----------------------------

@functools.partial(jax.jit, static_argnames=("relu_a",))
def pl_matmul_bn(a, w, relu_a=False):
    """Fused [ReLU ->] (M,Cin)@(Cin,Cout) -> BatchNorm.  Used for ReLUConvBN preprocess
    and the im2col'd 3x3 stem conv.  No bias input (it is always zero in the module)."""
    M, _ = a.shape
    N = w.shape[1]

    def kernel(a_ref, w_ref, o_ref):
        av = a_ref[...]
        if relu_a:
            av = jnp.maximum(av, 0.0)
        y = jnp.dot(av, w_ref[...], preferred_element_type=jnp.float32)
        o_ref[...] = _bn_norm(y)

    return pl.pallas_call(
        kernel, out_shape=jax.ShapeDtypeStruct((M, N), jnp.float32))(a, w)


@jax.jit
def pl_fact_reduce_bn(x_ee, x_oo, w1, w2):
    """Fused FactorizedReduce: ReLU -> two strided 1x1 convs -> concat -> BN.
    BN stats are per-channel so each half is normalized independently and written to its
    own lane slice of the output (no concat needed in-kernel)."""
    M, _ = x_ee.shape
    Ch = w1.shape[1]

    def kernel(a_ref, b_ref, w1_ref, w2_ref, o_ref):
        y1 = jnp.dot(jnp.maximum(a_ref[...], 0.0), w1_ref[...],
                     preferred_element_type=jnp.float32)
        y2 = jnp.dot(jnp.maximum(b_ref[...], 0.0), w2_ref[...],
                     preferred_element_type=jnp.float32)
        o_ref[:, :Ch] = _bn_norm(y1)
        o_ref[:, Ch:] = _bn_norm(y2)

    return pl.pallas_call(
        kernel, out_shape=jax.ShapeDtypeStruct((M, 2 * Ch), jnp.float32))(x_ee, x_oo, w1, w2)


@functools.partial(jax.jit, static_argnames=("K", "dilation", "stride", "relu_in"))
def pl_dw_pw_bn(xp, dw_w, pw_w, K, dilation, stride, relu_in):
    """Fused [ReLU ->] depthwise KxK (dilated, stride 1 or 2) -> pointwise 1x1 -> BN.
    stride==1: xp is the zero-padded NHWC input (N,Hp,Wp,C).
    stride==2: xp is the padded input packed as (N, Hp/2, 2, Wp/2, 2C) (a free contiguous
    reshape in the wrapper) so every tap of the stride-2 conv is a contiguous slice.
    The pointwise 1x1 is a lane-broadcast FMA (C<=16), the depthwise intermediate stays in
    VMEM/vregs, and the BN statistics are computed on the strided result (as in PyTorch)."""
    Cout = pw_w.shape[1]
    if stride == 1:
        N, Hp, Wp, C = xp.shape
        Ho = Hp - dilation * (K - 1)
        Wo = Wp - dilation * (K - 1)
        out_shape = (N, Ho, Wo, Cout)
    else:
        N, Hp2, _, Wp2, C2 = xp.shape
        C = C2 // 2
        pad = dilation * (K - 1) // 2
        Ho = Hp2 - pad
        Wo = Wp2 - pad
        out_shape = (N, Ho, 1, Wo, Cout)

    def kernel(x_ref, dw_ref, pw_ref, o_ref):
        acc = None
        for kh in range(K):
            for kw in range(K):
                r = kh * dilation
                c = kw * dilation
                if stride == 1:
                    patch = x_ref[:, r:r + Ho, c:c + Wo, :]
                else:
                    patch = x_ref[:, r // 2:r // 2 + Ho, (r % 2):(r % 2) + 1,
                                  c // 2:c // 2 + Wo, (c % 2) * C:(c % 2) * C + C]
                if relu_in:
                    patch = jnp.maximum(patch, 0.0)
                tap = dw_ref[kh * K + kw:kh * K + kw + 1, :]          # (1, C)
                term = patch * tap
                acc = term if acc is None else acc + term
        # pointwise 1x1 conv as VPU broadcast-FMA (avoids MXU + in-kernel reshapes)
        y = None
        for ci in range(C):
            contrib = acc[..., ci:ci + 1] * pw_ref[ci:ci + 1, :]
            y = contrib if y is None else y + contrib
        o_ref[...] = _bn_norm(y)

    return pl.pallas_call(
        kernel, out_shape=jax.ShapeDtypeStruct(out_shape, jnp.float32))(xp, dw_w, pw_w)


@functools.partial(jax.jit, static_argnames=("mode", "stride"))
def pl_pool_bn(xp, inv_count, mode, stride):
    """Fused 3x3 max/avg pooling (stride 1 or 2, avg has count_include_pad=False via the
    precomputed inv_count) followed by BatchNorm.  Same input packing as pl_dw_pw_bn."""
    if stride == 1:
        N, Hp, Wp, C = xp.shape
        Ho, Wo = Hp - 2, Wp - 2
        out_shape = (N, Ho, Wo, C)
    else:
        N, Hp2, _, Wp2, C2 = xp.shape
        C = C2 // 2
        Ho, Wo = Hp2 - 1, Wp2 - 1
        out_shape = (N, Ho, 1, Wo, C)

    def kernel(x_ref, ic_ref, o_ref):
        acc = None
        for kh in range(3):
            for kw in range(3):
                if stride == 1:
                    patch = x_ref[:, kh:kh + Ho, kw:kw + Wo, :]
                else:
                    patch = x_ref[:, kh // 2:kh // 2 + Ho, (kh % 2):(kh % 2) + 1,
                                  kw // 2:kw // 2 + Wo, (kw % 2) * C:(kw % 2) * C + C]
                if acc is None:
                    acc = patch
                elif mode == 'avg':
                    acc = acc + patch
                else:
                    acc = jnp.maximum(acc, patch)
        if mode == 'avg':
            acc = acc * ic_ref[...]
        o_ref[...] = _bn_norm(acc)

    return pl.pallas_call(
        kernel, out_shape=jax.ShapeDtypeStruct(out_shape, jnp.float32))(xp, inv_count)


@jax.jit
def pl_wsum(w, *xs):
    """MixedOp / cell-state weighted sum: out = sum_i w[i] * xs[i].
    The 'none' primitive is excluded by the caller (its contribution is exactly zero);
    no stacked intermediate is materialized, weights live in SMEM."""
    L = len(xs)

    def kernel(*refs):
        w_ref, o_ref = refs[0], refs[-1]
        acc = refs[1][...] * w_ref[0]
        for i in range(1, L):
            acc = acc + refs[1 + i][...] * w_ref[i]
        o_ref[...] = acc

    return pl.pallas_call(
        kernel,
        in_specs=[pl.BlockSpec(memory_space=pltpu.MemorySpace.SMEM)]
        + [pl.BlockSpec(memory_space=pltpu.MemorySpace.VMEM)] * L,
        out_specs=pl.BlockSpec(memory_space=pltpu.MemorySpace.VMEM),
        out_shape=jax.ShapeDtypeStruct(xs[0].shape, jnp.float32),
    )(w, *xs)


@jax.jit
def pl_softmax(x):
    """Row softmax of the architecture alphas."""
    def kernel(x_ref, o_ref):
        v = x_ref[...]
        m = jnp.max(v, axis=-1, keepdims=True)
        e = jnp.exp(v - m)
        o_ref[...] = e / jnp.sum(e, axis=-1, keepdims=True)

    return pl.pallas_call(
        kernel, out_shape=jax.ShapeDtypeStruct(x.shape, jnp.float32))(x)


@jax.jit
def pl_gap_fc(x3d, fc_w, fc_b):
    """Fused AdaptiveAvgPool2d(1) + Linear classifier: (N, H*W, C) -> (N, num_classes)."""
    N, HW, C = x3d.shape
    nc = fc_w.shape[1]

    def kernel(x_ref, w_ref, b_ref, o_ref):
        pooled = jnp.sum(x_ref[...], axis=1) * (1.0 / HW)
        o_ref[...] = jnp.dot(pooled, w_ref[...],
                             preferred_element_type=jnp.float32) + b_ref[...]

    return pl.pallas_call(
        kernel, out_shape=jax.ShapeDtypeStruct((N, nc), jnp.float32))(x3d, fc_w, fc_b)


# ----------------------------- glue / DARTS ops -----------------------------

def relu_conv_bn_fwd(x, p):
    N, H, W, C = x.shape
    Cout = p['w'].shape[1]
    y = pl_matmul_bn(x.reshape(N * H * W, C), p['w'], relu_a=True)
    return y.reshape(N, H, W, Cout)


def fact_reduce_fwd(x, p):
    N, H, W, C = x.shape
    Ch = p['w1'].shape[1]
    xe = x[:, ::2, ::2, :].reshape(-1, C)
    xo = x[:, 1::2, 1::2, :].reshape(-1, C)
    y = pl_fact_reduce_bn(xe, xo, p['w1'], p['w2'])
    return y.reshape(N, H // 2, W // 2, 2 * Ch)


def dw_pw_bn(x, dw_w, pw_w, K, pad, dilation, stride, relu_in=True):
    N, H, W, C = x.shape
    xp = jnp.pad(x, ((0, 0), (pad, pad), (pad, pad), (0, 0)))
    if stride == 2:
        xp = xp.reshape(N, (H + 2 * pad) // 2, 2, (W + 2 * pad) // 2, 2 * C)
    y = pl_dw_pw_bn(xp, dw_w, pw_w, K=K, dilation=dilation, stride=stride, relu_in=relu_in)
    if stride == 2:
        y = y.reshape(N, H // 2, W // 2, pw_w.shape[1])
    return y


def sep_conv_fwd(x, p, K, pad, stride):
    y = dw_pw_bn(x, p['dw1'], p['pw1'], K, pad, 1, stride)
    y = dw_pw_bn(y, p['dw2'], p['pw2'], K, pad, 1, 1)
    return y


def dil_conv_fwd(x, p, K, pad, dil, stride):
    return dw_pw_bn(x, p['dw'], p['pw'], K, pad, dil, stride)


def _pool_inv_counts(H, W, stride):
    Ho = (H - 1) // stride + 1
    Wo = (W - 1) // stride + 1
    ohs = np.arange(Ho)[:, None]
    ows = np.arange(Wo)[None, :]
    cnt = np.zeros((Ho, Wo), np.float32)
    for kh in range(3):
        for kw in range(3):
            r = ohs * stride + kh - 1
            c = ows * stride + kw - 1
            cnt += ((r >= 0) & (r < H) & (c >= 0) & (c < W)).astype(np.float32)
    return 1.0 / cnt


def pool_bn(x, mode, stride):
    N, H, W, C = x.shape
    Ho = (H - 1) // stride + 1
    Wo = (W - 1) // stride + 1
    # TODO(synk): -1e30 sentinel instead of -inf padding for max pool (fine for real activations).
    pad_val = 0.0 if mode == 'avg' else -1e30
    xp = jnp.pad(x, ((0, 0), (1, 1), (1, 1), (0, 0)), constant_values=pad_val)
    if stride == 2:
        xp = xp.reshape(N, (H + 2) // 2, 2, (W + 2) // 2, 2 * C)
    if mode == 'avg':
        ic = jnp.asarray(_pool_inv_counts(H, W, stride))
        ic = ic.reshape((1, Ho, Wo, 1) if stride == 1 else (1, Ho, 1, Wo, 1))
    else:
        ic = jnp.ones((1, 1, 1, 1) if stride == 1 else (1, 1, 1, 1, 1), jnp.float32)
    y = pl_pool_bn(xp, ic, mode=mode, stride=stride)
    if stride == 2:
        y = y.reshape(N, Ho, Wo, C)
    return y


@functools.partial(jax.jit, static_argnames=("stride",))
def mixed_op_outputs(x, p, stride):
    """The 7 non-'none' primitive outputs of one MixedOp edge, each from one fused kernel.
    ('none' contributes exactly zero to the weighted sum and is dropped.)"""
    N, H, W, C = x.shape
    assert H % 2 == 0 and W % 2 == 0
    outs = []
    for prim in PRIMITIVES[1:]:
        if prim == 'max_pool_3x3':
            outs.append(pool_bn(x, 'max', stride))
        elif prim == 'avg_pool_3x3':
            outs.append(pool_bn(x, 'avg', stride))
        elif prim == 'skip_connect':
            outs.append(x if stride == 1 else fact_reduce_fwd(x, p[prim]))
        elif prim in _SEP_CFG:
            K, pad = _SEP_CFG[prim]
            outs.append(sep_conv_fwd(x, p[prim], K, pad, stride))
        else:
            K, pad, dil = _DIL_CFG[prim]
            outs.append(dil_conv_fwd(x, p[prim], K, pad, dil, stride))
    return outs


def cell_fwd(s0, s1, cp, weights, steps, multiplier):
    s0 = fact_reduce_fwd(s0, cp['pre0']) if cp['reduction_prev'] else relu_conv_bn_fwd(s0, cp['pre0'])
    s1 = relu_conv_bn_fwd(s1, cp['pre1'])
    states = [s0, s1]
    offset = 0
    for _ in range(steps):
        tensors = []
        wchunks = []
        for j, h in enumerate(states):
            stride = 2 if (cp['reduction'] and j < 2) else 1
            tensors.extend(mixed_op_outputs(h, cp['ops'][offset + j], stride))
            wchunks.append(weights[offset + j, 1:])            # drop the 'none' weight
        offset += len(states)
        wv = jnp.concatenate(wchunks)
        s = pl_wsum(wv, *tensors)
        states.append(s)
    return jnp.concatenate(states[-multiplier:], axis=-1)


def stem_fwd(x, w):
    """Conv2d(3, 3*C, 3, padding=1, bias=False) + BN via im2col -> fused matmul+BN kernel."""
    N, H, W, Cin = x.shape
    xp = jnp.pad(x, ((0, 0), (1, 1), (1, 1), (0, 0)))
    cols = jnp.concatenate(
        [xp[:, kh:kh + H, kw:kw + W, :] for kh in range(3) for kw in range(3)], axis=-1)
    y = pl_matmul_bn(cols.reshape(N * H * W, 9 * Cin), w, relu_a=False)
    return y.reshape(N, H, W, w.shape[1])


def network_fwd(params, x_nchw, steps=4, multiplier=4):
    x = jnp.transpose(x_nchw, (0, 2, 3, 1)).astype(jnp.float32)   # NCHW -> NHWC once
    s0 = s1 = stem_fwd(x, params['stem_w'])
    w_normal = pl_softmax(params['alphas_normal'])
    w_reduce = pl_softmax(params['alphas_reduce'])
    for cp in params['cells']:
        weights = w_reduce if cp['reduction'] else w_normal
        s0, s1 = s1, cell_fwd(s0, s1, cp, weights, steps, multiplier)
    N, H, W, C = s1.shape
    logits = pl_gap_fc(s1.reshape(N, H * W, C), params['fc_w'], params['fc_b'].reshape(1, -1))
    return logits


# ----------------------------- parameter init -----------------------------

class ParamGen:
    def __init__(self, key):
        self._key = key
        self._n = 0

    def normal(self, shape, scale=0.1):
        self._n += 1
        return scale * jax.random.normal(jax.random.fold_in(self._key, self._n), shape, jnp.float32)


def _init_mixed_op(pg, C, stride):
    p = {}
    for prim in PRIMITIVES:
        if prim in _SEP_CFG:
            K, _ = _SEP_CFG[prim]
            p[prim] = dict(dw1=pg.normal((K * K, C)), pw1=pg.normal((C, C)),
                           dw2=pg.normal((K * K, C)), pw2=pg.normal((C, C)))
        elif prim in _DIL_CFG:
            K, _, _ = _DIL_CFG[prim]
            p[prim] = dict(dw=pg.normal((K * K, C)), pw=pg.normal((C, C)))
        elif prim == 'skip_connect' and stride != 1:
            p[prim] = dict(w1=pg.normal((C, C // 2)), w2=pg.normal((C, C // 2)))
        else:
            p[prim] = None
    return p


def init_network(key, C=4, num_classes=10, layers=3, steps=4, multiplier=4, stem_multiplier=3):
    pg = ParamGen(key)
    params = {}
    C_curr = stem_multiplier * C
    params['stem_w'] = pg.normal((9 * 3, C_curr))

    C_pp, C_p, C_curr = C_curr, C_curr, C
    cells = []
    reduction_prev = False
    for i in range(layers):
        if i in [layers // 3, 2 * layers // 3]:
            C_curr *= 2
            reduction = True
        else:
            reduction = False
        cp = {'reduction': reduction, 'reduction_prev': reduction_prev}
        if reduction_prev:
            cp['pre0'] = dict(w1=pg.normal((C_pp, C_curr // 2)), w2=pg.normal((C_pp, C_curr // 2)))
        else:
            cp['pre0'] = dict(w=pg.normal((C_pp, C_curr)))
        cp['pre1'] = dict(w=pg.normal((C_p, C_curr)))
        ops = []
        for s in range(steps):
            for j in range(2 + s):
                stride = 2 if reduction and j < 2 else 1
                ops.append(_init_mixed_op(pg, C_curr, stride))
        cp['ops'] = ops
        cells.append(cp)
        reduction_prev = reduction
        C_pp, C_p = C_p, multiplier * C_curr
    params['cells'] = cells

    k = sum(1 for i in range(steps) for _ in range(2 + i))        # 14 edges
    params['alphas_normal'] = 0.001 * jax.random.normal(
        jax.random.fold_in(key, 10001), (k, len(PRIMITIVES)), jnp.float32)
    params['alphas_reduce'] = 0.001 * jax.random.normal(
        jax.random.fold_in(key, 10002), (k, len(PRIMITIVES)), jnp.float32)

    params['fc_w'] = pg.normal((C_p, num_classes))
    params['fc_b'] = pg.normal((num_classes,))
    return params


# ----------------------------- main -----------------------------

if __name__ == "__main__":
    key = jax.random.PRNGKey(0)
    C, num_classes, layers, steps, multiplier = 4, 10, 3, 4, 4

    params = init_network(jax.random.fold_in(key, 1), C=C, num_classes=num_classes,
                          layers=layers, steps=steps, multiplier=multiplier)
    # Input matches the PyTorch module convention: NCHW, 3 input channels.
    x = jax.random.normal(jax.random.fold_in(key, 2), (2, 3, 16, 16), jnp.float32)

    logits = network_fwd(params, x, steps=steps, multiplier=multiplier)
    logits = jax.block_until_ready(logits)

    assert logits.shape == (2, num_classes)
    assert bool(jnp.all(jnp.isfinite(logits)))
    print("KERNEL_OK")
</pallas_src>

<mosaic_0001>
module attributes {stable_mosaic.version = 11 : i64} {
  func.func @kernel(%arg0: memref<512x27xf32, #tpu.memory_space<vmem>>, %arg1: memref<27x12xf32, #tpu.memory_space<vmem>>, %arg2: memref<512x12xf32, #tpu.memory_space<vmem>>) attributes {dimension_semantics = [], scalar_prefetch = 0 : i64, scratch_operands = 0 : i64, tpu.core_type = #tpu.core_type<tc>} {
    %c0 = arith.constant 0 : index
    %c0_0 = arith.constant 0 : index
    %0 = vector.load %arg0[%c0, %c0_0] : memref<512x27xf32, #tpu.memory_space<vmem>>, vector<512x27xf32>
    %c0_1 = arith.constant 0 : index
    %c0_2 = arith.constant 0 : index
    %1 = vector.load %arg1[%c0_1, %c0_2] : memref<27x12xf32, #tpu.memory_space<vmem>>, vector<27x12xf32>
    %cst = arith.constant dense<0.000000e+00> : vector<512x12xf32>
    %2 = tpu.matmul %0, %1, %cst {dimension_numbers = #tpu.dot_dimension_numbers<[1], [0], [0], [1], [0, 0, 1, 1], [], []>} : vector<512x27xf32>, vector<27x12xf32>, vector<512x12xf32> -> vector<512x12xf32>
    %cst_3 = arith.constant dense<0.000000e+00> : vector<12xf32>
    %3 = vector.multi_reduction <add>, %2, %cst_3 [0] : vector<512x12xf32> to vector<12xf32>
    %4 = vector.shape_cast %3 : vector<12xf32> to vector<1x12xf32>
    %cst_4 = arith.constant 0.001953125 : f32
    %5 = vector.broadcast %cst_4 : f32 to vector<1x12xf32>
    %6 = arith.mulf %4, %5 : vector<1x12xf32>
    %7 = vector.broadcast %6 : vector<1x12xf32> to vector<512x12xf32>
    %8 = arith.subf %2, %7 : vector<512x12xf32>
    %9 = arith.mulf %8, %8 : vector<512x12xf32>
    %cst_5 = arith.constant dense<0.000000e+00> : vector<12xf32>
    %10 = vector.multi_reduction <add>, %9, %cst_5 [0] : vector<512x12xf32> to vector<12xf32>
    %11 = vector.shape_cast %10 : vector<12xf32> to vector<1x12xf32>
    %cst_6 = arith.constant 0.001953125 : f32
    %12 = vector.broadcast %cst_6 : f32 to vector<1x12xf32>
    %13 = arith.mulf %11, %12 : vector<1x12xf32>
    %cst_7 = arith.constant 9.99999974E-6 : f32
    %14 = vector.broadcast %cst_7 : f32 to vector<1x12xf32>
    %15 = arith.addf %13, %14 : vector<1x12xf32>
    %16 = math.rsqrt %15 : vector<1x12xf32>
    %17 = vector.broadcast %16 : vector<1x12xf32> to vector<512x12xf32>
    %18 = arith.mulf %8, %17 : vector<512x12xf32>
    %c0_8 = arith.constant 0 : index
    %c0_9 = arith.constant 0 : index
    %19 = vector.load %arg2[%c0_8, %c0_9] : memref<512x12xf32, #tpu.memory_space<vmem>>, vector<512x12xf32>
    tpu.vector_store %arg2[%c0_8, %c0_9], %18 {strides = array<i32>} : memref<512x12xf32, #tpu.memory_space<vmem>>, vector<512x12xf32>,
    return
  }
}

</mosaic_0001>

<bundles_post_ra>
// kernel: pl_matmul_bn.1
= control target key start
LH: loop header
LB: loop body
LE: loop exit
PB: predicated region body
PF: predicated region fallthrough
CT: control target
= control target key end

     0   :  { %vm272_vm0 = vcmask 1042432   ;;  %vm79_vm1 = vcmask 220160   ;;  %vm485_vm2 = vcmask 97280   ;;  %s2475_s1 = inlined_call_operand.vmem [shape: f32[27,12], index: 1, kind: input, shape index: {}]   ;;  %s2476_s0 = inlined_call_operand.vmem [shape: f32[512,27], index: 0, kind: input, shape index: {}]   ;;  %s2477_s2 = inlined_call_operand.vmem [shape: f32[512,12], index: 2, kind: output, shape index: {}]  }
   0x1   :  { %v78_v0 = vld [vmem:[%s2475_s1 + $0x18] sm:$0x7]  ;;  %v77_v1 = vld [vmem:[%s2475_s1 + $0x10] sm:$0xff]  ;;  %v76_v2 = vld [vmem:[%s2475_s1 + $0x8] sm:$0xff] }
   0x2   :  { %1025 = vmatpush.msk.msra.mxu0 %vm272_vm0, %v78_v0  ;;  %1090 = vmatpush.msk.msra.mxu1 %vm272_vm0, %v78_v0  ;;  %v75_v3 = vld [vmem:[%s2475_s1] sm:$0xff]  ;;  %v12_v6 = vld [vmem:[%s2476_s0 + $0x8] sm:$0xff]  ;;  %v13_v8 = vld [vmem:[%s2476_s0 + $0x10] sm:$0xff] }
   0x3   :  { %1091 = vmatpush.msk.msra.mxu2 %vm272_vm0, %v78_v0  ;;  %1092 = vmatpush.msk.msra.mxu3 %vm272_vm0, %v78_v0  ;;  %v11_v4 = vld [vmem:[%s2476_s0] sm:$0xff]  ;;  %v28_v7 = vld [vmem:[%s2476_s0 + $0x88] sm:$0xff]  ;;  %v29_v9 = vld [vmem:[%s2476_s0 + $0x90] sm:$0xff] }
   0x4   :  { %289 = vmatpush.msra.mxu0 %v77_v1  ;;  %1093 = vmatpush.msra.mxu1 %v77_v1  ;;  %v27_v5 = vld [vmem:[%s2476_s0 + $0x80] sm:$0xff]  ;;  %v14_v10 = vld [vmem:[%s2476_s0 + $0x18] sm:$0xff]  ;;  %v44_v15 = vld [vmem:[%s2476_s0 + $0x108] sm:$0xff] }
   0x5   :  { %1094 = vmatpush.msra.mxu2 %v77_v1  ;;  %1095 = vmatpush.msra.mxu3 %v77_v1  ;;  %v30_v11 = vld [vmem:[%s2476_s0 + $0x98] sm:$0xff]  ;;  %v43_v12 = vld [vmem:[%s2476_s0 + $0x100] sm:$0xff]  ;;  %v16_v16 = vld [vmem:[%s2476_s0 + $0x28] sm:$0xff] }
   0x6   :  { %290 = vmatpush.msra.mxu0 %v76_v2  ;;  %1096 = vmatpush.msra.mxu1 %v76_v2  ;;  %v15_v13 = vld [vmem:[%s2476_s0 + $0x20] sm:$0xff]  ;;  %v32_v17 = vld [vmem:[%s2476_s0 + $0xa8] sm:$0xff]  ;;  %v45_v18 = vld [vmem:[%s2476_s0 + $0x110] sm:$0xff] }
   0x7   :  { %1097 = vmatpush.msra.mxu2 %v76_v2  ;;  %1098 = vmatpush.msra.mxu3 %v76_v2  ;;  %v31_v14 = vld [vmem:[%s2476_s0 + $0xa0] sm:$0xff]  ;;  %v17_v19 = vld [vmem:[%s2476_s0 + $0x30] sm:$0xff]  ;;  %v46_v21 = vld [vmem:[%s2476_s0 + $0x118] sm:$0xff] }
   0x8   :  { %291 = vmatpush.msra.mxu0 %v75_v3  ;;  %1099 = vmatpush.msra.mxu1 %v75_v3  ;;  %v33_v20 = vld [vmem:[%s2476_s0 + $0xb0] sm:$0xff]  ;;  %v18_v22 = vld [vmem:[%s2476_s0 + $0x38] sm:$0xff]  ;;  %v47_v24 = vld [vmem:[%s2476_s0 + $0x120] sm:$0xff] }
   0x9   :  { %1026 = vmatmul.msk.f32.vlgmr.msra.gmra.mxu0 %vm79_vm1, %v11_v4  ;;  %1042 = vmatmul.msk.f32.vlgmr.msra.gmra.mxu1 %vm79_vm1, %v27_v5  ;;  %v34_v23 = vld [vmem:[%s2476_s0 + $0xb8] sm:$0xff]  ;;  %v59_v25 = vld [vmem:[%s2476_s0 + $0x180] sm:$0xff]  ;;  %v48_v28 = vld [vmem:[%s2476_s0 + $0x128] sm:$0xff] }
   0xa   :  { %1100 = vmatpush.msra.mxu2 %v75_v3  ;;  %1101 = vmatpush.msra.mxu3 %v75_v3  ;;  %v19_v26 = vld [vmem:[%s2476_s0 + $0x40] sm:$0xff]  ;;  %v60_v29 = vld [vmem:[%s2476_s0 + $0x188] sm:$0xff]  ;;  %v49_v32 = vld [vmem:[%s2476_s0 + $0x130] sm:$0xff] }
   0xb   :  { %1058 = vmatmul.msk.f32.vlgmr.msra.gmra.mxu2 %vm79_vm1, %v43_v12  ;;  %1074 = vmatmul.msk.f32.vlgmr.msra.gmra.mxu3 %vm79_vm1, %v59_v25  ;;  %v35_v27 = vld [vmem:[%s2476_s0 + $0xc0] sm:$0xff]  ;;  %v20_v30 = vld [vmem:[%s2476_s0 + $0x48] sm:$0xff]  ;;  %v61_v33 = vld [vmem:[%s2476_s0 + $0x190] sm:$0xff] }
   0xc   :  { %v36_v31 = vld [vmem:[%s2476_s0 + $0xc8] sm:$0xff]  ;;  %v21_v34 = vld [vmem:[%s2476_s0 + $0x50] sm:$0xff]  ;;  %v50_v36 = vld [vmem:[%s2476_s0 + $0x138] sm:$0xff] }
   0xd   :  { %v37_v35 = vld [vmem:[%s2476_s0 + $0xd0] sm:$0xff]  ;;  %v62_v37 = vld [vmem:[%s2476_s0 + $0x198] sm:$0xff]  ;;  %v51_v40 = vld [vmem:[%s2476_s0 + $0x140] sm:$0xff] }
   0xe   :  { %v22_v38 = vld [vmem:[%s2476_s0 + $0x58] sm:$0xff]  ;;  %v63_v41 = vld [vmem:[%s2476_s0 + $0x1a0] sm:$0xff]  ;;  %v52_v44 = vld [vmem:[%s2476_s0 + $0x148] sm:$0xff] }
   0xf   :  { %v38_v39 = vld [vmem:[%s2476_s0 + $0xd8] sm:$0xff]  ;;  %v23_v42 = vld [vmem:[%s2476_s0 + $0x60] sm:$0xff]  ;;  %v64_v45 = vld [vmem:[%s2476_s0 + $0x1a8] sm:$0xff] }
  0x10   :  { %v39_v43 = vld [vmem:[%s2476_s0 + $0xe0] sm:$0xff]  ;;  %v24_v46 = vld [vmem:[%s2476_s0 + $0x68] sm:$0xff]  ;;  %v53_v48 = vld [vmem:[%s2476_s0 + $0x150] sm:$0xff] }
  0x11   :  { %1027 = vmatmul.msk.f32.gmra.mxu0 %vm79_vm1, %v12_v6  ;;  %1043 = vmatmul.msk.f32.gmra.mxu1 %vm79_vm1, %v28_v7  ;;  %v40_v47 = vld [vmem:[%s2476_s0 + $0xe8] sm:$0xff]  ;;  %v65_v49 = vld [vmem:[%s2476_s0 + $0x1b0] sm:$0xff]  ;;  %v54_v52 = vld [vmem:[%s2476_s0 + $0x158] sm:$0xff] }
  0x12   :  { %v25_v50 = vld [vmem:[%s2476_s0 + $0x70] sm:$0xff]  ;;  %v66_v53 = vld [vmem:[%s2476_s0 + $0x1b8] sm:$0xff]  ;;  %v55_v56 = vld [vmem:[%s2476_s0 + $0x160] sm:$0xff] }
  0x13   :  { %1059 = vmatmul.msk.f32.gmra.mxu2 %vm79_vm1, %v44_v15  ;;  %1075 = vmatmul.msk.f32.gmra.mxu3 %vm79_vm1, %v60_v29  ;;  %v41_v51 = vld [vmem:[%s2476_s0 + $0xf0] sm:$0xff]  ;;  %v26_v54 = vld [vmem:[%s2476_s0 + $0x78] sm:$0xff]  ;;  %v67_v57 = vld [vmem:[%s2476_s0 + $0x1c0] sm:$0xff] }
  0x14   :  { %v42_v55 = vld [vmem:[%s2476_s0 + $0xf8] sm:$0xff]  ;;  %v56_v60 = vld [vmem:[%s2476_s0 + $0x168] sm:$0xff]  ;;  %v57_v0 = vld [vmem:[%s2476_s0 + $0x170] sm:$0xff] }
  0x15   :  { %v68_v61 = vld [vmem:[%s2476_s0 + $0x1c8] sm:$0xff]  ;;  %v69_v1 = vld [vmem:[%s2476_s0 + $0x1d0] sm:$0xff]  ;;  %v58_v4 = vld [vmem:[%s2476_s0 + $0x178] sm:$0xff] }
  0x16   :  { %v70_v5 = vld [vmem:[%s2476_s0 + $0x1d8] sm:$0xff]  ;;  %v71_v7 = vld [vmem:[%s2476_s0 + $0x1e0] sm:$0xff]  ;;  %v73_v15 = vld [vmem:[%s2476_s0 + $0x1f0] sm:$0xff] }
  0x19   :  { %1028 = vmatmul.msk.f32.gmra.mxu0 %vm79_vm1, %v13_v8  ;;  %1044 = vmatmul.msk.f32.gmra.mxu1 %vm79_vm1, %v29_v9 }
  0x1b   :  { %1060 = vmatmul.msk.f32.gmra.mxu2 %vm79_vm1, %v45_v18  ;;  %1076 = vmatmul.msk.f32.gmra.mxu3 %vm79_vm1, %v61_v33 }
  0x21   :  { %1029 = vmatmul.msk.f32.gmra.mxu0 %vm79_vm1, %v14_v10  ;;  %1045 = vmatmul.msk.f32.gmra.mxu1 %vm79_vm1, %v30_v11  ;;  %v72_v11 = vld [vmem:[%s2476_s0 + $0x1e8] sm:$0xff] }
  0x23   :  { %1061 = vmatmul.msk.f32.gmra.mxu2 %vm79_vm1, %v46_v21  ;;  %1077 = vmatmul.msk.f32.gmra.mxu3 %vm79_vm1, %v62_v37 }
  0x29   :  { %1030 = vmatmul.msk.f32.gmra.mxu0 %vm79_vm1, %v15_v13  ;;  %1046 = vmatmul.msk.f32.gmra.mxu1 %vm79_vm1, %v31_v14 }
  0x2b   :  { %1062 = vmatmul.msk.f32.gmra.mxu2 %vm79_vm1, %v47_v24  ;;  %1078 = vmatmul.msk.f32.gmra.mxu3 %vm79_vm1, %v63_v41 }
  0x31   :  { %1031 = vmatmul.msk.f32.gmra.mxu0 %vm79_vm1, %v16_v16  ;;  %1047 = vmatmul.msk.f32.gmra.mxu1 %vm79_vm1, %v32_v17 }
  0x33   :  { %1063 = vmatmul.msk.f32.gmra.mxu2 %vm79_vm1, %v48_v28  ;;  %1079 = vmatmul.msk.f32.gmra.mxu3 %vm79_vm1, %v64_v45 }
  0x39   :  { %1032 = vmatmul.msk.f32.gmra.mxu0 %vm79_vm1, %v17_v19  ;;  %1048 = vmatmul.msk.f32.gmra.mxu1 %vm79_vm1, %v33_v20  ;;  %v74_v19 = vld [vmem:[%s2476_s0 + $0x1f8] sm:$0xff] }
  0x3b   :  { %1064 = vmatmul.msk.f32.gmra.mxu2 %vm79_vm1, %v49_v32  ;;  %1080 = vmatmul.msk.f32.gmra.mxu3 %vm79_vm1, %v65_v49 }
  0x41   :  { %1033 = vmatmul.msk.f32.gmra.mxu0 %vm79_vm1, %v18_v22  ;;  %1049 = vmatmul.msk.f32.gmra.mxu1 %vm79_vm1, %v34_v23 }
  0x43   :  { %1065 = vmatmul.msk.f32.gmra.mxu2 %vm79_vm1, %v50_v36  ;;  %1081 = vmatmul.msk.f32.gmra.mxu3 %vm79_vm1, %v66_v53 }
  0x49   :  { %1034 = vmatmul.msk.f32.gmra.mxu0 %vm79_vm1, %v19_v26  ;;  %1050 = vmatmul.msk.f32.gmra.mxu1 %vm79_vm1, %v35_v27 }
  0x4b   :  { %1066 = vmatmul.msk.f32.gmra.mxu2 %vm79_vm1, %v51_v40  ;;  %1082 = vmatmul.msk.f32.gmra.mxu3 %vm79_vm1, %v67_v57 }
  0x51   :  { %1035 = vmatmul.msk.f32.gmra.mxu0 %vm79_vm1, %v20_v30  ;;  %1051 = vmatmul.msk.f32.gmra.mxu1 %vm79_vm1, %v36_v31 }
  0x53   :  { %1067 = vmatmul.msk.f32.gmra.mxu2 %vm79_vm1, %v52_v44  ;;  %1083 = vmatmul.msk.f32.gmra.mxu3 %vm79_vm1, %v68_v61 }
  0x59   :  { %1036 = vmatmul.msk.f32.gmra.mxu0 %vm79_vm1, %v21_v34  ;;  %1052 = vmatmul.msk.f32.gmra.mxu1 %vm79_vm1, %v37_v35 }
  0x5b   :  { %1068 = vmatmul.msk.f32.gmra.mxu2 %vm79_vm1, %v53_v48  ;;  %1084 = vmatmul.msk.f32.gmra.mxu3 %vm79_vm1, %v69_v1 }
  0x61   :  { %1037 = vmatmul.msk.f32.gmra.mxu0 %vm79_vm1, %v22_v38  ;;  %1053 = vmatmul.msk.f32.gmra.mxu1 %vm79_vm1, %v38_v39 }
  0x63   :  { %1069 = vmatmul.msk.f32.gmra.mxu2 %vm79_vm1, %v54_v52  ;;  %1085 = vmatmul.msk.f32.gmra.mxu3 %vm79_vm1, %v70_v5 }
  0x69   :  { %1038 = vmatmul.msk.f32.gmra.mxu0 %vm79_vm1, %v23_v42  ;;  %1054 = vmatmul.msk.f32.gmra.mxu1 %vm79_vm1, %v39_v43 }
  0x6b   :  { %1070 = vmatmul.msk.f32.gmra.mxu2 %vm79_vm1, %v55_v56  ;;  %1086 = vmatmul.msk.f32.gmra.mxu3 %vm79_vm1, %v71_v7 }
  0x71   :  { %1039 = vmatmul.msk.f32.gmra.mxu0 %vm79_vm1, %v24_v46  ;;  %1055 = vmatmul.msk.f32.gmra.mxu1 %vm79_vm1, %v40_v47 }
  0x73   :  { %1071 = vmatmul.msk.f32.gmra.mxu2 %vm79_vm1, %v56_v60  ;;  %1087 = vmatmul.msk.f32.gmra.mxu3 %vm79_vm1, %v72_v11 }
  0x79   :  { %1040 = vmatmul.msk.f32.gmra.mxu0 %vm79_vm1, %v25_v50  ;;  %1056 = vmatmul.msk.f32.gmra.mxu1 %vm79_vm1, %v41_v51 }
  0x7b   :  { %1072 = vmatmul.msk.f32.gmra.mxu2 %vm79_vm1, %v57_v0  ;;  %1088 = vmatmul.msk.f32.gmra.mxu3 %vm79_vm1, %v73_v15 }
  0x81   :  { %1041 = vmatmul.msk.f32.gmra.mxu0 %vm79_vm1, %v26_v54  ;;  %1057 = vmatmul.msk.f32.gmra.mxu1 %vm79_vm1, %v42_v55 }
  0x83   :  { %1073 = vmatmul.msk.f32.gmra.mxu2 %vm79_vm1, %v58_v4  ;;  %1089 = vmatmul.msk.f32.gmra.mxu3 %vm79_vm1, %v74_v19 }
  0x86   :  { %v1347_v58 = vpop.f32.mrf.mxu0  ;;  %v1349_v59 = vpop.f32.mrf.mxu1 }
  0x87   :  { %v486_v38 = vsel %vm485_vm2, %v1347_v58, 0.0 }
  0x8e   :  { %v1359_v62 = vpop.f32.mrf.mxu0  ;;  %v1361_v63 = vpop.f32.mrf.mxu1 }
  0x8f   :  { %v1393_v10 = vpop.f32.mrf.mxu2  ;;  %v1427_v24 = vpop.f32.mrf.mxu3  ;;  %v487_v36 = vsel %vm485_vm2, %v1359_v62, 0.0 }
  0x90   :  { %v488_v40 = vadd.f32 %v487_v36, %v486_v38 }
  0x96   :  { %v1371_v2 = vpop.f32.mrf.mxu0  ;;  %v1373_v3 = vpop.f32.mrf.mxu1 }
  0x97   :  { %v1403_v14 = vpop.f32.mrf.mxu2  ;;  %v1435_v28 = vpop.f32.mrf.mxu3  ;;  %v489_v39 = vsel %vm485_vm2, %v1371_v2, 0.0 }
  0x98   :  { %v490_v42 = vadd.f32 %v489_v39, %v488_v40 }
  0x9e   :  { %v1383_v6 = vpop.f32.mrf.mxu0  ;;  %v1388_v8 = vpop.f32.mrf.mxu1 }
  0x9f   :  { %v1413_v18 = vpop.f32.mrf.mxu2  ;;  %v1443_v32 = vpop.f32.mrf.mxu3  ;;  %v491_v41 = vsel %vm485_vm2, %v1383_v6, 0.0 }
  0xa0   :  { %v492_v45 = vadd.f32 %v491_v41, %v490_v42 }
  0xa6   :  { %v1391_v9 = vpop.f32.mrf.mxu0  ;;  %v1399_v12 = vpop.f32.mrf.mxu1 }
  0xa7   :  { %v1423_v22 = vpop.f32.mrf.mxu2  ;;  %v1453_v37 = vpop.f32.mrf.mxu3  ;;  %v493_v44 = vsel %vm485_vm2, %v1391_v9, 0.0 }
  0xa8   :  { %2515 = vst [vmem:[#allocation2_spill] sm:$0xff] %v1423_v22  ;;  %v494_v48 = vadd.f32 %v493_v44, %v492_v45 }
  0xae   :  { %v1401_v13 = vpop.f32.mrf.mxu0  ;;  %v1411_v17 = vpop.f32.mrf.mxu1 }
  0xaf   :  { %v1431_v26 = vpop.f32.mrf.mxu2  ;;  %v495_v47 = vsel %vm485_vm2, %v1401_v13, 0.0  ;;  %v1473_v52 = vpop.f32.mrf.mxu3 }
  0xb0   :  { %2516 = vst [vmem:[#allocation3_spill] sm:$0xff] %v1431_v26  ;;  %v496_v51 = vadd.f32 %v495_v47, %v494_v48 }
  0xb6   :  { %v1409_v16 = vpop.f32.mrf.mxu0  ;;  %v1421_v21 = vpop.f32.mrf.mxu1 }
  0xb7   :  { %v1441_v31 = vpop.f32.mrf.mxu2  ;;  %v497_v50 = vsel %vm485_vm2, %v1409_v16, 0.0  ;;  %v1493_v19 = vpop.f32.mrf.mxu3 }
  0xb8   :  { %v498_v54 = vadd.f32 %v497_v50, %v496_v51 }
  0xbe   :  { %v1419_v20 = vpop.f32.mrf.mxu0  ;;  %v1429_v25 = vpop.f32.mrf.mxu1 }
  0xbf   :  { %v1449_v35 = vpop.f32.mrf.mxu2  ;;  %v499_v53 = vsel %vm485_vm2, %v1419_v20, 0.0 }
  0xc0   :  { %v500_v57 = vadd.f32 %v499_v53, %v498_v54  ;;  %v1509_v53 = vpop.f32.mrf.mxu3  ;;  %v517_v54 = vsel %vm485_vm2, %v1349_v59, 0.0 }
  0xc6   :  { %v1425_v23 = vpop.f32.mrf.mxu0  ;;  %v1437_v29 = vpop.f32.mrf.mxu1 }
  0xc7   :  { %v1469_v49 = vpop.f32.mrf.mxu2  ;;  %v501_v56 = vsel %vm485_vm2, %v1425_v23, 0.0 }
  0xc8   :  { %v502_v61 = vadd.f32 %v501_v56, %v500_v57  ;;  %v519_v57 = vsel %vm485_vm2, %v1361_v63, 0.0 }
  0xce   :  { %v1433_v27 = vpop.f32.mrf.mxu0  ;;  %v1447_v34 = vpop.f32.mrf.mxu1 }
  0xcf   :  { %v503_v60 = vsel %vm485_vm2, %v1433_v27, 0.0  ;;  %v1487_v5 = vpop.f32.mrf.mxu2 }
  0xd0   :  { %v504_v4 = vadd.f32 %v503_v60, %v502_v61  ;;  %2517 = vst [vmem:[#allocation4_spill] sm:$0xff] %v1487_v5  ;;  %v521_v61 = vsel %vm485_vm2, %v1373_v3, 0.0 }
  0xd6   :  { %v1439_v30 = vpop.f32.mrf.mxu0  ;;  %v1465_v46 = vpop.f32.mrf.mxu1 }
  0xd7   :  { %v505_v1 = vsel %vm485_vm2, %v1439_v30, 0.0  ;;  %v1505_v48 = vpop.f32.mrf.mxu2 }
  0xd8   :  { %v506_v11 = vadd.f32 %v505_v1, %v504_v4  ;;  %2519 = vst [vmem:[#allocation6_spill] sm:$0xff] %v1505_v48 }
  0xde   :  { %v1445_v33 = vpop.f32.mrf.mxu0  ;;  %v1483_v0 = vpop.f32.mrf.mxu1 }
  0xdf   :  { %v507_v7 = vsel %vm485_vm2, %v1445_v33, 0.0 }
  0xe0   :  { %v508_v38 = vadd.f32 %v507_v7, %v506_v11  ;;  %v523_v7 = vsel %vm485_vm2, %v1388_v8, 0.0 }
  0xe6   :  { %v1461_v43 = vpop.f32.mrf.mxu0  ;;  %v1501_v44 = vpop.f32.mrf.mxu1 }
  0xe7   :  { %v509_v36 = vsel %vm485_vm2, %v1461_v43, 0.0  ;;  %2518 = vst [vmem:[#allocation5_spill] sm:$0xff] %v1501_v44 }
  0xe8   :  { %v510_v40 = vadd.f32 %v509_v36, %v508_v38  ;;  %v1521_v36 = vpop.f32.mrf.mxu2  ;;  %v525_v38 = vsel %vm485_vm2, %v1399_v12, 0.0 }
  0xee   :  { %v1477_v55 = vpop.f32.mrf.mxu0  ;;  %v1517_v4 = vpop.f32.mrf.mxu1 }
  0xef   :  { %v511_v39 = vsel %vm485_vm2, %v1477_v55, 0.0  ;;  %2520 = vst [vmem:[#allocation7_spill] sm:$0xff] %v1517_v4 }
  0xf0   :  { %v512_v42 = vadd.f32 %v511_v39, %v510_v40  ;;  %v1525_v40 = vpop.f32.mrf.mxu3 }
  0xf6   :  { %v1491_v15 = vpop.f32.mrf.mxu0 }
  0xf7   :  { %v513_v41 = vsel %vm485_vm2, %v1491_v15, 0.0 }
  0xf8   :  { %v514_v45 = vadd.f32 %v513_v41, %v512_v42  ;;  %v527_v41 = vsel %vm485_vm2, %v1411_v17, 0.0 }
  0xfe   :  { %v1503_v47 = vpop.f32.mrf.mxu0 }
  0xff   :  { %v515_v50 = vsel %vm485_vm2, %v1503_v47, 0.0 }
 0x100   :  { %v516_v51 = vadd.f32 %v515_v50, %v514_v45  ;;  %v529_v45 = vsel %vm485_vm2, %v1421_v21, 0.0 }
 0x102   :  { %v518_v56 = vadd.f32 %v517_v54, %v516_v51  ;;  %v531_v51 = vsel %vm485_vm2, %v1429_v25, 0.0 }
 0x104   :  { %v520_v60 = vadd.f32 %v519_v57, %v518_v56  ;;  %v1533_v56 = vpop.f32.mrf.mxu1  ;;  %v533_v57 = vsel %vm485_vm2, %v1437_v29, 0.0 }
 0x105   :  { %2521 = vst [vmem:[#allocation8_spill] sm:$0xff] %v1533_v56 }
 0x106   :  { %v522_v1 = vadd.f32 %v521_v61, %v520_v60  ;;  %v1537_v61 = vpop.f32.mrf.mxu2 }
 0x108   :  { %v524_v11 = vadd.f32 %v523_v7, %v522_v1  ;;  %v535_v1 = vsel %vm485_vm2, %v1447_v34, 0.0 }
 0x10a   :  { %v526_v39 = vadd.f32 %v525_v38, %v524_v11  ;;  %v1541_v11 = vpop.f32.mrf.mxu3  ;;  %v537_v38 = vsel %vm485_vm2, %v1465_v46, 0.0 }
 0x10b   :  { %2522 = vst [vmem:[#allocation9_spill] sm:$0xff] %v1541_v11 }
 0x10c   :  { %v528_v42 = vadd.f32 %v527_v41, %v526_v39  ;;  %v539_v41 = vsel %vm485_vm2, %v1483_v0, 0.0 }
 0x10e   :  { %v530_v50 = vadd.f32 %v529_v45, %v528_v42  ;;  %v541_v45 = vsel %vm485_vm2, %v1501_v44, 0.0 }
 0x110   :  { %v532_v54 = vadd.f32 %v531_v51, %v530_v50  ;;  %v1549_v51 = vpop.f32.mrf.mxu1 }
 0x111   :  { %2523 = vst [vmem:[#allocation10_spill] sm:$0xff] %v1549_v51 }
 0x112   :  { %v534_v60 = vadd.f32 %v533_v57, %v532_v54  ;;  %v543_v54 = vsel %vm485_vm2, %v1517_v4, 0.0  ;;  %v551_v4 = vsel %vm485_vm2, %v1403_v14, 0.0 }
 0x114   :  { %v536_v7 = vadd.f32 %v535_v1, %v534_v60  ;;  %v1553_v60 = vpop.f32.mrf.mxu2  ;;  %v545_v1 = vsel %vm485_vm2, %v1533_v56, 0.0 }
 0x116   :  { %v538_v39 = vadd.f32 %v537_v38, %v536_v7  ;;  %v547_v7 = vsel %vm485_vm2, %v1549_v51, 0.0 }
 0x118   :  { %v540_v42 = vadd.f32 %v539_v41, %v538_v39  ;;  %v1559_v39 = vpop.f32.mrf.mxu3 }
 0x119   :  { %2524 = vst [vmem:[#allocation11_spill] sm:$0xff] %v1559_v39 }
 0x11a   :  { %v542_v50 = vadd.f32 %v541_v45, %v540_v42  ;;  %v549_v42 = vsel %vm485_vm2, %v1393_v10, 0.0 }
 0x11c   :  { %v544_v57 = vadd.f32 %v543_v54, %v542_v50  ;;  %v553_v54 = vsel %vm485_vm2, %v1413_v18, 0.0  ;;  %v1567_v56 = vpop.f32.mrf.mxu2 }
 0x11d   :  { %2525 = vst [vmem:[#allocation12_spill] sm:$0xff] %v1567_v56 }
 0x11e   :  { %v546_v38 = vadd.f32 %v545_v1, %v544_v57  ;;  %v555_v57 = vsel %vm485_vm2, %v1423_v22, 0.0 }
 0x120   :  { %v548_v41 = vadd.f32 %v547_v7, %v546_v38  ;;  %v1571_v51 = vpop.f32.mrf.mxu3  ;;  %v557_v7 = vsel %vm485_vm2, %v1431_v26, 0.0 }
 0x121   :  { %2526 = vst [vmem:[#allocation13_spill] sm:$0xff] %v1571_v51 }
 0x122   :  { %v550_v45 = vadd.f32 %v549_v42, %v548_v41  ;;  %v559_v41 = vsel %vm485_vm2, %v1441_v31, 0.0  ;;  %v561_v42 = vsel %vm485_vm2, %v1449_v35, 0.0 }
 0x124   :  { %v552_v50 = vadd.f32 %v551_v4, %v550_v45  ;;  %v1581_v22 = vpop.f32.mrf.mxu2 }
 0x125   :  { %2527 = vst [vmem:[#allocation14_spill] sm:$0xff] %v1581_v22 }
 0x126   :  { %v554_v44 = vadd.f32 %v553_v54, %v552_v50  ;;  %v563_v50 = vsel %vm485_vm2, %v1469_v49, 0.0 }
 0x128   :  { %v556_v1 = vadd.f32 %v555_v57, %v554_v44  ;;  %v565_v44 = vsel %vm485_vm2, %v1487_v5, 0.0  ;;  %v1585_v26 = vpop.f32.mrf.mxu3 }
 0x129   :  { %2528 = vst [vmem:[#allocation15_spill] sm:$0xff] %v1585_v26 }
 0x12a   :  { %v558_v38 = vadd.f32 %v557_v7, %v556_v1  ;;  %v567_v1 = vsel %vm485_vm2, %v1505_v48, 0.0 }
 0x12c   :  { %v560_v4 = vadd.f32 %v559_v41, %v558_v38  ;;  %v569_v38 = vsel %vm485_vm2, %v1521_v36, 0.0  ;;  %v1595_v5 = vpop.f32.mrf.mxu2 }
 0x12d   :  { %2529 = vst [vmem:[#allocation16_spill] sm:$0xff] %v1595_v5 }
 0x12e   :  { %v562_v45 = vadd.f32 %v561_v42, %v560_v4  ;;  %v571_v4 = vsel %vm485_vm2, %v1537_v61, 0.0 }
 0x130   :  { %v564_v54 = vadd.f32 %v563_v50, %v562_v45  ;;  %v573_v45 = vsel %vm485_vm2, %v1553_v60, 0.0  ;;  %v1599_v48 = vpop.f32.mrf.mxu3 }
 0x131   :  { %2530 = vst [vmem:[#allocation17_spill] sm:$0xff] %v1599_v48 }
 0x132   :  { %v566_v57 = vadd.f32 %v565_v44, %v564_v54  ;;  %v575_v54 = vsel %vm485_vm2, %v1567_v56, 0.0 }
 0x134   :  { %v568_v7 = vadd.f32 %v567_v1, %v566_v57  ;;  %v577_v57 = vsel %vm485_vm2, %v1581_v22, 0.0  ;;  %v579_v1 = vsel %vm485_vm2, %v1595_v5, 0.0  ;;  %v587_v22 = vsel %vm485_vm2, %v1453_v37, 0.0 }
 0x136   :  { %v570_v41 = vadd.f32 %v569_v38, %v568_v7 }
 0x138   :  { %v572_v42 = vadd.f32 %v571_v4, %v570_v41  ;;  %v581_v41 = vsel %vm485_vm2, %v1427_v24, 0.0  ;;  %v1611_v56 = vpop.f32.mrf.mxu3 }
 0x13a   :  { %v574_v50 = vadd.f32 %v573_v45, %v572_v42  ;;  %v583_v42 = vsel %vm485_vm2, %v1435_v28, 0.0 }
 0x13c   :  { %v576_v44 = vadd.f32 %v575_v54, %v574_v50  ;;  %v585_v50 = vsel %vm485_vm2, %v1443_v32, 0.0 }
 0x13e   :  { %v578_v7 = vadd.f32 %v577_v57, %v576_v44  ;;  %v589_v44 = vsel %vm485_vm2, %v1473_v52, 0.0 }
 0x140   :  { %v580_v38 = vadd.f32 %v579_v1, %v578_v7  ;;  %v591_v1 = vsel %vm485_vm2, %v1493_v19, 0.0 }
 0x142   :  { %v582_v4 = vadd.f32 %v581_v41, %v580_v38  ;;  %v593_v38 = vsel %vm485_vm2, %v1509_v53, 0.0 }
 0x144   :  { %v584_v45 = vadd.f32 %v583_v42, %v582_v4  ;;  %v595_v4 = vsel %vm485_vm2, %v1525_v40, 0.0 }
 0x146   :  { %v586_v54 = vadd.f32 %v585_v50, %v584_v45  ;;  %v1623_v45 = vpop.f32.mrf.mxu3 }
 0x148   :  { %v588_v5 = vadd.f32 %v587_v22, %v586_v54  ;;  %v597_v22 = vsel %vm485_vm2, %v1541_v11, 0.0 }
 0x14a   :  { %v590_v57 = vadd.f32 %v589_v44, %v588_v5  ;;  %v599_v5 = vsel %vm485_vm2, %v1559_v39, 0.0  ;;  %v601_v44 = vsel %vm485_vm2, %v1571_v51, 0.0 }
 0x14c   :  { %v592_v7 = vadd.f32 %v591_v1, %v590_v57  ;;  %v603_v1 = vsel %vm485_vm2, %v1585_v26, 0.0 }
 0x14e   :  { %v594_v41 = vadd.f32 %v593_v38, %v592_v7  ;;  %v605_v38 = vsel %vm485_vm2, %v1599_v48, 0.0 }
 0x150   :  { %v596_v42 = vadd.f32 %v595_v4, %v594_v41  ;;  %v482_v4 = vpop.f32.mrf.mxu3 }
 0x152   :  { %v598_v50 = vadd.f32 %v597_v22, %v596_v42  ;;  %v607_v42 = vsel %vm485_vm2, %v1611_v56, 0.0 }
 0x154   :  { %v600_v54 = vadd.f32 %v599_v5, %v598_v50  ;;  %v609_v50 = vsel %vm485_vm2, %v1623_v45, 0.0  ;;  %v611_v5 = vsel %vm485_vm2, %v482_v4, 0.0 }
 0x156   :  { %v602_v57 = vadd.f32 %v601_v44, %v600_v54 }
 0x158   :  { %v604_v7 = vadd.f32 %v603_v1, %v602_v57 }
 0x15a   :  { %v606_v41 = vadd.f32 %v605_v38, %v604_v7 }
 0x15c   :  { %v608_v22 = vadd.f32 %v607_v42, %v606_v41 }
 0x15e   :  { %v610_v51 = vadd.f32 %v609_v50, %v608_v22 }
 0x160   :  { %v612_v54 = vadd.f32 %v611_v5, %v610_v51 }
 0x162   :  { %v613_v44 = vrot.slane %v612_v54, 4 }
 0x164   :  { %v614_v39 = vadd.f32 %v613_v44, %v612_v54 }
 0x166   :  { %v615_v26 = vrot.slane %v614_v39, 2 }
 0x168   :  { %v616_v57 = vadd.f32 %v615_v26, %v614_v39 }
 0x16a   :  { %v617_v1 = vrot.slane %v616_v57, 1 }
 0x16c   :  { %v618_v11 = vadd.f32 %v617_v1, %v616_v57 }
 0x16e   :  { %v1640_v48 = vmul.f32 0.001953125, %v618_v11 }
 0x170   :  { %v1643_v7 = vsub.f32 %v482_v4, %v1640_v48  ;;  %v1647_v38 = vsub.f32 %v1347_v58, %v1640_v48  ;;  %v1651_v41 = vsub.f32 %v1359_v62, %v1640_v48  ;;  %v1655_v51 = vsub.f32 %v1371_v2, %v1640_v48 }
 0x171   :  { %v1659_v26 = vsub.f32 %v1383_v6, %v1640_v48  ;;  %v1667_v58 = vsub.f32 %v1391_v9, %v1640_v48  ;;  %v1673_v2 = vsub.f32 %v1401_v13, %v1640_v48  ;;  %v1681_v50 = vsub.f32 %v1409_v16, %v1640_v48 }
 0x172   :  { %2531 = vst [vmem:[#allocation18_spill] sm:$0xff] %v1643_v7  ;;  %v684_v11 = vmul.f32 %v1647_v38, %v1647_v38  ;;  %v685_v39 = vmul.f32 %v1651_v41, %v1651_v41  ;;  %v686_v62 = vmul.f32 %v1655_v51, %v1655_v51  ;;  %v1688_v13 = vsub.f32 %v1419_v20, %v1640_v48 }
 0x173   :  { %v687_v6 = vmul.f32 %v1659_v26, %v1659_v26  ;;  %v688_v9 = vmul.f32 %v1667_v58, %v1667_v58  ;;  %v689_v44 = vmul.f32 %v1673_v2, %v1673_v2  ;;  %v1695_v16 = vsub.f32 %v1425_v23, %v1640_v48 }
 0x174   :  { %v748_v4 = vsel %vm485_vm2, %v684_v11, 0.0  ;;  %v749_v42 = vsel %vm485_vm2, %v685_v39, 0.0  ;;  %v751_v5 = vsel %vm485_vm2, %v686_v62, 0.0  ;;  %v690_v11 = vmul.f32 %v1681_v50, %v1681_v50 }
 0x175   :  { %v750_v22 = vadd.f32 %v749_v42, %v748_v4  ;;  %v753_v57 = vsel %vm485_vm2, %v687_v6, 0.0  ;;  %v755_v39 = vsel %vm485_vm2, %v688_v9, 0.0  ;;  %v1702_v20 = vsub.f32 %v1433_v27, %v1640_v48 }
 0x176   :  { %v691_v4 = vmul.f32 %v1688_v13, %v1688_v13  ;;  %v757_v6 = vsel %vm485_vm2, %v689_v44, 0.0  ;;  %v1709_v23 = vsub.f32 %v1439_v30, %v1640_v48  ;;  %v759_v9 = vsel %vm485_vm2, %v690_v11, 0.0 }
 0x177   :  { %v752_v54 = vadd.f32 %v751_v5, %v750_v22  ;;  %v692_v22 = vmul.f32 %v1695_v16, %v1695_v16  ;;  %v1716_v27 = vsub.f32 %v1445_v33, %v1640_v48  ;;  %v1723_v30 = vsub.f32 %v1461_v43, %v1640_v48 }
 0x178   :  { %v761_v44 = vsel %vm485_vm2, %v691_v4, 0.0  ;;  %v1730_v33 = vsub.f32 %v1477_v55, %v1640_v48  ;;  %v1737_v43 = vsub.f32 %v1491_v15, %v1640_v48  ;;  %v1744_v55 = vsub.f32 %v1503_v47, %v1640_v48 }
 0x179   :  { %v754_v1 = vadd.f32 %v753_v57, %v752_v54  ;;  %v693_v54 = vmul.f32 %v1702_v20, %v1702_v20  ;;  %v763_v11 = vsel %vm485_vm2, %v692_v22, 0.0  ;;  %v1751_v15 = vsub.f32 %v1349_v59, %v1640_v48 }
 0x17a   :  { %v1758_v47 = vsub.f32 %v1361_v63, %v1640_v48  ;;  %v1765_v59 = vsub.f32 %v1373_v3, %v1640_v48  ;;  %v1772_v63 = vsub.f32 %v1388_v8, %v1640_v48  ;;  %v1779_v3 = vsub.f32 %v1399_v12, %v1640_v48 }
 0x17b   :  { %v756_v62 = vadd.f32 %v755_v39, %v754_v1  ;;  %v694_v1 = vmul.f32 %v1709_v23, %v1709_v23  ;;  %v765_v4 = vsel %vm485_vm2, %v693_v54, 0.0  ;;  %v1786_v8 = vsub.f32 %v1411_v17, %v1640_v48 }
 0x17c   :  { %v1793_v12 = vsub.f32 %v1421_v21, %v1640_v48  ;;  %v1800_v17 = vsub.f32 %v1429_v25, %v1640_v48  ;;  %v1807_v21 = vsub.f32 %v1437_v29, %v1640_v48  ;;  %v1814_v25 = vsub.f32 %v1447_v34, %v1640_v48 }
 0x17d   :  { %v758_v42 = vadd.f32 %v757_v6, %v756_v62  ;;  %v695_v62 = vmul.f32 %v1716_v27, %v1716_v27  ;;  %v767_v22 = vsel %vm485_vm2, %v694_v1, 0.0  ;;  %v1821_v29 = vsub.f32 %v1465_v46, %v1640_v48 }
 0x17e   :  { %v1828_v34 = vsub.f32 %v1483_v0, %v1640_v48 }
 0x17f   :  { %v760_v5 = vadd.f32 %v759_v9, %v758_v42  ;;  %v696_v42 = vmul.f32 %v1723_v30, %v1723_v30  ;;  %v769_v54 = vsel %vm485_vm2, %v695_v62, 0.0 }
 0x180   :  { %2532 = vst [vmem:[#allocation19_spill] sm:$0xff] %v1828_v34 }
 0x181   :  { %v762_v57 = vadd.f32 %v761_v44, %v760_v5  ;;  %v697_v5 = vmul.f32 %v1730_v33, %v1730_v33  ;;  %v771_v1 = vsel %vm485_vm2, %v696_v42, 0.0 }
 0x183   :  { %v764_v39 = vadd.f32 %v763_v11, %v762_v57  ;;  %v698_v57 = vmul.f32 %v1737_v43, %v1737_v43  ;;  %v773_v62 = vsel %vm485_vm2, %v697_v5, 0.0 }
 0x185   :  { %v766_v6 = vadd.f32 %v765_v4, %v764_v39  ;;  %v699_v39 = vmul.f32 %v1744_v55, %v1744_v55  ;;  %v775_v42 = vsel %vm485_vm2, %v698_v57, 0.0 }
 0x187   :  { %v768_v9 = vadd.f32 %v767_v22, %v766_v6  ;;  %v700_v6 = vmul.f32 %v1751_v15, %v1751_v15  ;;  %v777_v5 = vsel %vm485_vm2, %v699_v39, 0.0 }
 0x189   :  { %v770_v44 = vadd.f32 %v769_v54, %v768_v9  ;;  %v701_v9 = vmul.f32 %v1758_v47, %v1758_v47  ;;  %v779_v57 = vsel %vm485_vm2, %v700_v6, 0.0 }
 0x18b   :  { %v772_v11 = vadd.f32 %v771_v1, %v770_v44  ;;  %v702_v44 = vmul.f32 %v1765_v59, %v1765_v59  ;;  %v781_v39 = vsel %vm485_vm2, %v701_v9, 0.0 }
 0x18d   :  { %v774_v4 = vadd.f32 %v773_v62, %v772_v11  ;;  %v703_v11 = vmul.f32 %v1772_v63, %v1772_v63  ;;  %v783_v6 = vsel %vm485_vm2, %v702_v44, 0.0 }
 0x18f   :  { %v776_v22 = vadd.f32 %v775_v42, %v774_v4  ;;  %v704_v4 = vmul.f32 %v1779_v3, %v1779_v3  ;;  %v785_v9 = vsel %vm485_vm2, %v703_v11, 0.0 }
 0x191   :  { %v778_v54 = vadd.f32 %v777_v5, %v776_v22  ;;  %v705_v22 = vmul.f32 %v1786_v8, %v1786_v8  ;;  %v787_v44 = vsel %vm485_vm2, %v704_v4, 0.0 }
 0x193   :  { %v780_v1 = vadd.f32 %v779_v57, %v778_v54  ;;  %v706_v54 = vmul.f32 %v1793_v12, %v1793_v12  ;;  %v789_v11 = vsel %vm485_vm2, %v705_v22, 0.0 }
 0x195   :  { %v782_v62 = vadd.f32 %v781_v39, %v780_v1  ;;  %v707_v1 = vmul.f32 %v1800_v17, %v1800_v17  ;;  %v791_v4 = vsel %vm485_vm2, %v706_v54, 0.0 }
 0x197   :  { %v784_v42 = vadd.f32 %v783_v6, %v782_v62  ;;  %v708_v62 = vmul.f32 %v1807_v21, %v1807_v21  ;;  %v793_v22 = vsel %vm485_vm2, %v707_v1, 0.0 }
 0x199   :  { %v786_v5 = vadd.f32 %v785_v9, %v784_v42  ;;  %v709_v42 = vmul.f32 %v1814_v25, %v1814_v25  ;;  %v795_v54 = vsel %vm485_vm2, %v708_v62, 0.0 }
 0x19b   :  { %v788_v57 = vadd.f32 %v787_v44, %v786_v5  ;;  %v2533_v5 = vld [vmem:[#allocation5_spill] sm:$0xff]  ;;  %v710_v44 = vmul.f32 %v1821_v29, %v1821_v29  ;;  %v797_v1 = vsel %vm485_vm2, %v709_v42, 0.0 }
 0x19c   :  { %v1835_v46 = vsub.f32 %v2533_v5, %v1640_v48 }
 0x19d   :  { %v790_v39 = vadd.f32 %v789_v11, %v788_v57  ;;  %v2534_v11 = vld [vmem:[#allocation7_spill] sm:$0xff]  ;;  %v799_v62 = vsel %vm485_vm2, %v710_v44, 0.0 }
 0x19e   :  { %v1842_v0 = vsub.f32 %v2534_v11, %v1640_v48  ;;  %v712_v5 = vmul.f32 %v1835_v46, %v1835_v46 }
 0x19f   :  { %v792_v6 = vadd.f32 %v791_v4, %v790_v39  ;;  %v711_v39 = vmul.f32 %v1828_v34, %v1828_v34 }
 0x1a0   :  { %v713_v34 = vmul.f32 %v1842_v0, %v1842_v0  ;;  %v803_v44 = vsel %vm485_vm2, %v712_v5, 0.0 }
 0x1a1   :  { %v794_v9 = vadd.f32 %v793_v22, %v792_v6  ;;  %v2535_v6 = vld [vmem:[#allocation8_spill] sm:$0xff]  ;;  %v801_v42 = vsel %vm485_vm2, %v711_v39, 0.0 }
 0x1a2   :  { %v1849_v22 = vsub.f32 %v2535_v6, %v1640_v48  ;;  %v805_v39 = vsel %vm485_vm2, %v713_v34, 0.0 }
 0x1a3   :  { %v796_v57 = vadd.f32 %v795_v54, %v794_v9  ;;  %v2536_v54 = vld [vmem:[#allocation10_spill] sm:$0xff] }
 0x1a4   :  { %v1856_v11 = vsub.f32 %v2536_v54, %v1640_v48  ;;  %v714_v6 = vmul.f32 %v1849_v22, %v1849_v22 }
 0x1a5   :  { %v798_v4 = vadd.f32 %v797_v1, %v796_v57  ;;  %v1863_v1 = vsub.f32 %v1393_v10, %v1640_v48  ;;  %v1877_v10 = vsub.f32 %v1413_v18, %v1640_v48 }
 0x1a6   :  { %2537 = vst [vmem:[#allocation5_spill] sm:$0xff] %v1856_v11  ;;  %v715_v54 = vmul.f32 %v1856_v11, %v1856_v11  ;;  %v807_v5 = vsel %vm485_vm2, %v714_v6, 0.0 }
 0x1a7   :  { %v800_v9 = vadd.f32 %v799_v62, %v798_v4  ;;  %2538 = vst [vmem:[#allocation7_spill] sm:$0xff] %v1863_v1  ;;  %v1870_v62 = vsub.f32 %v1403_v14, %v1640_v48 }
 0x1a8   :  { %v809_v34 = vsel %vm485_vm2, %v715_v54, 0.0 }
 0x1a9   :  { %v802_v57 = vadd.f32 %v801_v42, %v800_v9  ;;  %v716_v42 = vmul.f32 %v1863_v1, %v1863_v1  ;;  %v717_v11 = vmul.f32 %v1870_v62, %v1870_v62  ;;  %v718_v1 = vmul.f32 %v1877_v10, %v1877_v10 }
 0x1ab   :  { %v804_v4 = vadd.f32 %v803_v44, %v802_v57  ;;  %v2539_v44 = vld [vmem:[#allocation2_spill] sm:$0xff]  ;;  %v811_v6 = vsel %vm485_vm2, %v716_v42, 0.0  ;;  %v813_v54 = vsel %vm485_vm2, %v717_v11, 0.0  ;;  %v815_v42 = vsel %vm485_vm2, %v718_v1, 0.0 }
 0x1ac   :  { %v1884_v14 = vsub.f32 %v2539_v44, %v1640_v48 }
 0x1ad   :  { %v806_v9 = vadd.f32 %v805_v39, %v804_v4  ;;  %v2540_v39 = vld [vmem:[#allocation3_spill] sm:$0xff] }
 0x1ae   :  { %v1891_v18 = vsub.f32 %v2540_v39, %v1640_v48  ;;  %v719_v44 = vmul.f32 %v1884_v14, %v1884_v14 }
 0x1af   :  { %v808_v57 = vadd.f32 %v807_v5, %v806_v9  ;;  %v1898_v5 = vsub.f32 %v1441_v31, %v1640_v48  ;;  %v1912_v31 = vsub.f32 %v1469_v49, %v1640_v48 }
 0x1b0   :  { %2541 = vst [vmem:[#allocation8_spill] sm:$0xff] %v1891_v18  ;;  %v720_v39 = vmul.f32 %v1891_v18, %v1891_v18  ;;  %v817_v11 = vsel %vm485_vm2, %v719_v44, 0.0 }
 0x1b1   :  { %v810_v4 = vadd.f32 %v809_v34, %v808_v57  ;;  %2542 = vst [vmem:[#allocation10_spill] sm:$0xff] %v1898_v5  ;;  %v1905_v34 = vsub.f32 %v1449_v35, %v1640_v48 }
 0x1b2   :  { %v819_v1 = vsel %vm485_vm2, %v720_v39, 0.0 }
 0x1b3   :  { %v812_v9 = vadd.f32 %v811_v6, %v810_v4  ;;  %v721_v6 = vmul.f32 %v1898_v5, %v1898_v5  ;;  %v722_v18 = vmul.f32 %v1905_v34, %v1905_v34  ;;  %v723_v5 = vmul.f32 %v1912_v31, %v1912_v31 }
 0x1b5   :  { %v814_v57 = vadd.f32 %v813_v54, %v812_v9  ;;  %v2543_v54 = vld [vmem:[#allocation4_spill] sm:$0xff]  ;;  %v821_v44 = vsel %vm485_vm2, %v721_v6, 0.0  ;;  %v823_v39 = vsel %vm485_vm2, %v722_v18, 0.0  ;;  %v825_v6 = vsel %vm485_vm2, %v723_v5, 0.0 }
 0x1b6   :  { %v1919_v35 = vsub.f32 %v2543_v54, %v1640_v48 }
 0x1b7   :  { %v816_v4 = vadd.f32 %v815_v42, %v814_v57  ;;  %v2544_v42 = vld [vmem:[#allocation6_spill] sm:$0xff] }
 0x1b8   :  { %v1926_v49 = vsub.f32 %v2544_v42, %v1640_v48  ;;  %v724_v54 = vmul.f32 %v1919_v35, %v1919_v35 }
 0x1b9   :  { %v818_v9 = vadd.f32 %v817_v11, %v816_v4  ;;  %v1933_v11 = vsub.f32 %v1521_v36, %v1640_v48  ;;  %v1947_v36 = vsub.f32 %v1553_v60, %v1640_v48 }
 0x1ba   :  { %2545 = vst [vmem:[#allocation2_spill] sm:$0xff] %v1926_v49  ;;  %v725_v42 = vmul.f32 %v1926_v49, %v1926_v49  ;;  %v827_v18 = vsel %vm485_vm2, %v724_v54, 0.0 }
 0x1bb   :  { %v820_v57 = vadd.f32 %v819_v1, %v818_v9  ;;  %2546 = vst [vmem:[#allocation3_spill] sm:$0xff] %v1933_v11  ;;  %v1940_v1 = vsub.f32 %v1537_v61, %v1640_v48 }
 0x1bc   :  { %v829_v5 = vsel %vm485_vm2, %v725_v42, 0.0 }
 0x1bd   :  { %v822_v4 = vadd.f32 %v821_v44, %v820_v57  ;;  %2547 = vst [vmem:[#allocation4_spill] sm:$0xff] %v1940_v1  ;;  %v726_v44 = vmul.f32 %v1933_v11, %v1933_v11  ;;  %v727_v49 = vmul.f32 %v1940_v1, %v1940_v1  ;;  %v728_v11 = vmul.f32 %v1947_v36, %v1947_v36 }
 0x1bf   :  { %v824_v9 = vadd.f32 %v823_v39, %v822_v4  ;;  %v2548_v39 = vld [vmem:[#allocation12_spill] sm:$0xff]  ;;  %v831_v54 = vsel %vm485_vm2, %v726_v44, 0.0  ;;  %v833_v42 = vsel %vm485_vm2, %v727_v49, 0.0  ;;  %v835_v44 = vsel %vm485_vm2, %v728_v11, 0.0 }
 0x1c0   :  { %v1954_v61 = vsub.f32 %v2548_v39, %v1640_v48 }
 0x1c1   :  { %v826_v57 = vadd.f32 %v825_v6, %v824_v9  ;;  %v2549_v6 = vld [vmem:[#allocation14_spill] sm:$0xff] }
 0x1c2   :  { %v1961_v60 = vsub.f32 %v2549_v6, %v1640_v48  ;;  %v729_v1 = vmul.f32 %v1954_v61, %v1954_v61 }
 0x1c3   :  { %v828_v4 = vadd.f32 %v827_v18, %v826_v57  ;;  %v2550_v18 = vld [vmem:[#allocation16_spill] sm:$0xff] }
 0x1c4   :  { %v1968_v39 = vsub.f32 %v2550_v18, %v1640_v48  ;;  %v730_v6 = vmul.f32 %v1961_v60, %v1961_v60  ;;  %v837_v49 = vsel %vm485_vm2, %v729_v1, 0.0 }
 0x1c5   :  { %v830_v9 = vadd.f32 %v829_v5, %v828_v4  ;;  %v1975_v5 = vsub.f32 %v1427_v24, %v1640_v48  ;;  %v1989_v24 = vsub.f32 %v1443_v32, %v1640_v48  ;;  %v2003_v32 = vsub.f32 %v1473_v52, %v1640_v48 }
 0x1c6   :  { %v731_v18 = vmul.f32 %v1968_v39, %v1968_v39  ;;  %v839_v11 = vsel %vm485_vm2, %v730_v6, 0.0  ;;  %v2017_v52 = vsub.f32 %v1509_v53, %v1640_v48 }
 0x1c7   :  { %v832_v57 = vadd.f32 %v831_v54, %v830_v9  ;;  %v1982_v54 = vsub.f32 %v1435_v28, %v1640_v48  ;;  %v1996_v28 = vsub.f32 %v1453_v37, %v1640_v48  ;;  %2552 = vst [vmem:[#allocation12_spill] sm:$0xff] %v2003_v32  ;;  %v2010_v37 = vsub.f32 %v1493_v19, %v1640_v48 }
 0x1c8   :  { %v841_v1 = vsel %vm485_vm2, %v731_v18, 0.0  ;;  %2554 = vst [vmem:[#allocation16_spill] sm:$0xff] %v2017_v52  ;;  %v2024_v19 = vsub.f32 %v1525_v40, %v1640_v48 }
 0x1c9   :  { %v834_v4 = vadd.f32 %v833_v42, %v832_v57  ;;  %v732_v42 = vmul.f32 %v1975_v5, %v1975_v5  ;;  %2551 = vst [vmem:[#allocation6_spill] sm:$0xff] %v1996_v28 }
 0x1ca   :  { %2553 = vst [vmem:[#allocation14_spill] sm:$0xff] %v2010_v37 }
 0x1cb   :  { %v836_v9 = vadd.f32 %v835_v44, %v834_v4  ;;  %v733_v44 = vmul.f32 %v1982_v54, %v1982_v54  ;;  %v843_v6 = vsel %vm485_vm2, %v732_v42, 0.0  ;;  %2555 = vst [vmem:[#allocation20_spill] sm:$0xff] %v2024_v19 }
 0x1cd   :  { %v838_v57 = vadd.f32 %v837_v49, %v836_v9  ;;  %v734_v49 = vmul.f32 %v1989_v24, %v1989_v24  ;;  %v845_v18 = vsel %vm485_vm2, %v733_v44, 0.0 }
 0x1cf   :  { %v840_v4 = vadd.f32 %v839_v11, %v838_v57  ;;  %v735_v11 = vmul.f32 %v1996_v28, %v1996_v28  ;;  %v847_v42 = vsel %vm485_vm2, %v734_v49, 0.0 }
 0x1d1   :  { %v842_v9 = vadd.f32 %v841_v1, %v840_v4  ;;  %v736_v1 = vmul.f32 %v2003_v32, %v2003_v32  ;;  %v849_v44 = vsel %vm485_vm2, %v735_v11, 0.0  ;;  %v738_v32 = vmul.f32 %v2017_v52, %v2017_v52 }
 0x1d3   :  { %v844_v57 = vadd.f32 %v843_v6, %v842_v9  ;;  %v737_v6 = vmul.f32 %v2010_v37, %v2010_v37  ;;  %v851_v49 = vsel %vm485_vm2, %v736_v1, 0.0  ;;  %v739_v37 = vmul.f32 %v2024_v19, %v2024_v19 }
 0x1d4   :  { %v855_v1 = vsel %vm485_vm2, %v738_v32, 0.0 }
 0x1d5   :  { %v846_v4 = vadd.f32 %v845_v18, %v844_v57  ;;  %v2556_v18 = vld [vmem:[#allocation9_spill] sm:$0xff]  ;;  %v853_v11 = vsel %vm485_vm2, %v737_v6, 0.0  ;;  %v857_v6 = vsel %vm485_vm2, %v739_v37, 0.0 }
 0x1d6   :  { %v2031_v53 = vsub.f32 %v2556_v18, %v1640_v48 }
 0x1d7   :  { %v848_v9 = vadd.f32 %v847_v42, %v846_v4  ;;  %v2558_v42 = vld [vmem:[#allocation11_spill] sm:$0xff] }
 0x1d8   :  { %2557 = vst [vmem:[#allocation9_spill] sm:$0xff] %v2031_v53  ;;  %v2038_v40 = vsub.f32 %v2558_v42, %v1640_v48  ;;  %v740_v52 = vmul.f32 %v2031_v53, %v2031_v53 }
 0x1d9   :  { %v850_v57 = vadd.f32 %v849_v44, %v848_v9  ;;  %v2560_v44 = vld [vmem:[#allocation13_spill] sm:$0xff] }
 0x1da   :  { %2559 = vst [vmem:[#allocation11_spill] sm:$0xff] %v2038_v40  ;;  %v2045_v18 = vsub.f32 %v2560_v44, %v1640_v48  ;;  %v741_v19 = vmul.f32 %v2038_v40, %v2038_v40  ;;  %v859_v32 = vsel %vm485_vm2, %v740_v52, 0.0 }
 0x1db   :  { %v852_v4 = vadd.f32 %v851_v49, %v850_v57  ;;  %v2562_v49 = vld [vmem:[#allocation15_spill] sm:$0xff] }
 0x1dc   :  { %2561 = vst [vmem:[#allocation13_spill] sm:$0xff] %v2045_v18  ;;  %v2052_v42 = vsub.f32 %v2562_v49, %v1640_v48  ;;  %v742_v53 = vmul.f32 %v2045_v18, %v2045_v18  ;;  %v861_v37 = vsel %vm485_vm2, %v741_v19, 0.0 }
 0x1dd   :  { %v854_v9 = vadd.f32 %v853_v11, %v852_v4  ;;  %v2564_v11 = vld [vmem:[#allocation17_spill] sm:$0xff] }
 0x1de   :  { %2563 = vst [vmem:[#allocation15_spill] sm:$0xff] %v2052_v42  ;;  %v2059_v44 = vsub.f32 %v2564_v11, %v1640_v48  ;;  %v743_v49 = vmul.f32 %v2052_v42, %v2052_v42  ;;  %v863_v52 = vsel %vm485_vm2, %v742_v53, 0.0 }
 0x1df   :  { %v856_v57 = vadd.f32 %v855_v1, %v854_v9  ;;  %v2066_v1 = vsub.f32 %v1611_v56, %v1640_v48 }
 0x1e0   :  { %2565 = vst [vmem:[#allocation17_spill] sm:$0xff] %v2059_v44  ;;  %v744_v11 = vmul.f32 %v2059_v44, %v2059_v44 }
 0x1e1   :  { %v858_v4 = vadd.f32 %v857_v6, %v856_v57  ;;  %2566 = vst [vmem:[#allocation21_spill] sm:$0xff] %v2066_v1  ;;  %v2073_v6 = vsub.f32 %v1623_v45, %v1640_v48  ;;  %v745_v56 = vmul.f32 %v2066_v1, %v2066_v1  ;;  %v747_v48 = vmul.f32 %v1643_v7, %v1643_v7 }
 0x1e3   :  { %v860_v9 = vadd.f32 %v859_v32, %v858_v4  ;;  %2567 = vst [vmem:[#allocation22_spill] sm:$0xff] %v2073_v6  ;;  %v865_v32 = vsel %vm485_vm2, %v743_v49, 0.0  ;;  %v746_v19 = vmul.f32 %v2073_v6, %v2073_v6  ;;  %v869_v45 = vsel %vm485_vm2, %v745_v56, 0.0 }
 0x1e5   :  { %v862_v57 = vadd.f32 %v861_v37, %v860_v9  ;;  %v867_v9 = vsel %vm485_vm2, %v744_v11, 0.0  ;;  %v871_v53 = vsel %vm485_vm2, %v746_v19, 0.0 }
 0x1e7   :  { %v864_v4 = vadd.f32 %v863_v52, %v862_v57  ;;  %v873_v52 = vsel %vm485_vm2, %v747_v48, 0.0 }
 0x1e9   :  { %v866_v18 = vadd.f32 %v865_v32, %v864_v4 }
 0x1eb   :  { %v868_v37 = vadd.f32 %v867_v9, %v866_v18 }
 0x1ed   :  { %v870_v44 = vadd.f32 %v869_v45, %v868_v37 }
 0x1ef   :  { %v872_v57 = vadd.f32 %v871_v53, %v870_v44 }
 0x1f1   :  { %v874_v1 = vadd.f32 %v873_v52, %v872_v57 }
 0x1f3   :  { %v875_v49 = vrot.slane %v874_v1, 4 }
 0x1f5   :  { %v876_v4 = vadd.f32 %v875_v49, %v874_v1 }
 0x1f7   :  { %v877_v32 = vrot.slane %v876_v4, 2 }
 0x1f9   :  { %v878_v42 = vadd.f32 %v877_v32, %v876_v4 }
 0x1fb   :  { %v879_v6 = vrot.slane %v878_v42, 1 }
 0x1fd   :  { %v880_v40 = vadd.f32 %v879_v6, %v878_v42 }
 0x1ff   :  { %v881_v11 = vmul.f32 0.001953125, %v880_v40 }
 0x201   :  { %v882_v18 = vadd.f32 1e-05, %v881_v11 }
 0x203   :  { %1102 = vrsqrt.f32 %v882_v18  ;;  %vm889_vm4 = vweird.f32 %v882_v18 }
 0x209   :  { %v1103_v9 = vpop.eup %1102 }
 0x20a   :  { %v884_v7 = vmul.f32 %v1103_v9, %v882_v18  ;;  %vm890_vm3 = vweird.f32 %v1103_v9 }
 0x20b   :  { %vm891_vm5 = vmor %vm889_vm4, %vm890_vm3 }
 0x20c   :  { %v885_v28 = vmul.f32 %v1103_v9, %v884_v7 }
 0x20e   :  { %v886_v56 = vmul.f32 0.5, %v885_v28 }
 0x210   :  { %v887_v37 = vsub.f32 1.5, %v886_v56 }
 0x212   :  { %v888_v19 = vmul.f32 %v1103_v9, %v887_v37 }
 0x214   :  { %v2089_v44 = vsel %vm891_vm5, %v1103_v9, %v888_v19 }
 0x215   :  { %v893_v1 = vmul.f32 %v2089_v44, %v1647_v38  ;;  %v894_v42 = vmul.f32 %v2089_v44, %v1651_v41  ;;  %v895_v40 = vmul.f32 %v2089_v44, %v1655_v51  ;;  %v896_v7 = vmul.f32 %v2089_v44, %v1659_v26 }
 0x216   :  { %v897_v28 = vmul.f32 %v2089_v44, %v1667_v58  ;;  %v898_v38 = vmul.f32 %v2089_v44, %v1673_v2  ;;  %v899_v41 = vmul.f32 %v2089_v44, %v1681_v50  ;;  %v900_v51 = vmul.f32 %v2089_v44, %v1688_v13 }
 0x217   :  { %957 = vst.msk [vmem:[%s2477_s2] sm:$0xff] %vm485_vm2, %v893_v1  ;;  %v901_v26 = vmul.f32 %v2089_v44, %v1695_v16  ;;  %v902_v58 = vmul.f32 %v2089_v44, %v1702_v20  ;;  %v903_v2 = vmul.f32 %v2089_v44, %v1709_v23  ;;  %v904_v50 = vmul.f32 %v2089_v44, %v1716_v27 }
 0x218   :  { %958 = vst.msk [vmem:[%s2477_s2 + $0x8] sm:$0xff] %vm485_vm2, %v894_v42  ;;  %v905_v13 = vmul.f32 %v2089_v44, %v1723_v30  ;;  %v906_v16 = vmul.f32 %v2089_v44, %v1730_v33  ;;  %v907_v20 = vmul.f32 %v2089_v44, %v1737_v43  ;;  %v908_v23 = vmul.f32 %v2089_v44, %v1744_v55 }
 0x219   :  { %959 = vst.msk [vmem:[%s2477_s2 + $0x10] sm:$0xff] %vm485_vm2, %v895_v40  ;;  %v909_v27 = vmul.f32 %v2089_v44, %v1751_v15  ;;  %v910_v30 = vmul.f32 %v2089_v44, %v1758_v47  ;;  %v911_v33 = vmul.f32 %v2089_v44, %v1765_v59  ;;  %v912_v43 = vmul.f32 %v2089_v44, %v1772_v63  ;;  %v2579_v40 = vld [vmem:[#allocation16_spill] sm:$0xff] }
 0x21a   :  { %960 = vst.msk [vmem:[%s2477_s2 + $0x18] sm:$0xff] %vm485_vm2, %v896_v7  ;;  %v913_v55 = vmul.f32 %v2089_v44, %v1779_v3  ;;  %v914_v15 = vmul.f32 %v2089_v44, %v1786_v8  ;;  %v915_v47 = vmul.f32 %v2089_v44, %v1793_v12  ;;  %v916_v59 = vmul.f32 %v2089_v44, %v1800_v17  ;;  %v2568_v12 = vld [vmem:[#allocation19_spill] sm:$0xff] }
 0x21b   :  { %961 = vst.msk [vmem:[%s2477_s2 + $0x20] sm:$0xff] %vm485_vm2, %v897_v28  ;;  %v917_v63 = vmul.f32 %v2089_v44, %v1807_v21  ;;  %v918_v3 = vmul.f32 %v2089_v44, %v1814_v25  ;;  %v919_v8 = vmul.f32 %v2089_v44, %v1821_v29  ;;  %v920_v17 = vmul.f32 %v2089_v44, %v2568_v12  ;;  %v2580_v28 = vld [vmem:[#allocation20_spill] sm:$0xff] }
 0x21c   :  { %962 = vst.msk [vmem:[%s2477_s2 + $0x28] sm:$0xff] %vm485_vm2, %v898_v38  ;;  %v921_v21 = vmul.f32 %v2089_v44, %v1835_v46  ;;  %v922_v25 = vmul.f32 %v2089_v44, %v1842_v0  ;;  %v923_v29 = vmul.f32 %v2089_v44, %v1849_v22  ;;  %v2569_v46 = vld [vmem:[#allocation5_spill] sm:$0xff]  ;;  %v2570_v0 = vld [vmem:[#allocation7_spill] sm:$0xff]  ;;  %v926_v22 = vmul.f32 %v2089_v44, %v1870_v62  ;;  %v2571_v62 = vld [vmem:[#allocation8_spill] sm:$0xff] }
 0x21d   :  { %963 = vst.msk [vmem:[%s2477_s2 + $0x30] sm:$0xff] %vm485_vm2, %v899_v41  ;;  %v924_v6 = vmul.f32 %v2089_v44, %v2569_v46  ;;  %v925_v48 = vmul.f32 %v2089_v44, %v2570_v0  ;;  %v927_v45 = vmul.f32 %v2089_v44, %v1877_v10  ;;  %v928_v53 = vmul.f32 %v2089_v44, %v1884_v14  ;;  %v2572_v10 = vld [vmem:[#allocation10_spill] sm:$0xff]  ;;  %v2581_v41 = vld [vmem:[#allocation9_spill] sm:$0xff] }
 0x21e   :  { %964 = vst.msk [vmem:[%s2477_s2 + $0x38] sm:$0xff] %vm485_vm2, %v900_v51  ;;  %v929_v57 = vmul.f32 %v2089_v44, %v2571_v62  ;;  %v930_v52 = vmul.f32 %v2089_v44, %v2572_v10  ;;  %v931_v14 = vmul.f32 %v2089_v44, %v1905_v34  ;;  %v932_v49 = vmul.f32 %v2089_v44, %v1912_v31  ;;  %v2573_v34 = vld [vmem:[#allocation2_spill] sm:$0xff]  ;;  %v2574_v31 = vld [vmem:[#allocation3_spill] sm:$0xff] }
 0x21f   :  { %965 = vst.msk [vmem:[%s2477_s2 + $0x40] sm:$0xff] %vm485_vm2, %v901_v26  ;;  %v933_v4 = vmul.f32 %v2089_v44, %v1919_v35  ;;  %v934_v32 = vmul.f32 %v2089_v44, %v2573_v34  ;;  %v935_v11 = vmul.f32 %v2089_v44, %v2574_v31  ;;  %v2575_v35 = vld [vmem:[#allocation4_spill] sm:$0xff]  ;;  %v937_v9 = vmul.f32 %v2089_v44, %v1947_v36  ;;  %v2582_v26 = vld [vmem:[#allocation11_spill] sm:$0xff] }
 0x220   :  { %966 = vst.msk [vmem:[%s2477_s2 + $0x48] sm:$0xff] %vm485_vm2, %v902_v58  ;;  %v936_v18 = vmul.f32 %v2089_v44, %v2575_v35  ;;  %v938_v56 = vmul.f32 %v2089_v44, %v1954_v61  ;;  %v939_v37 = vmul.f32 %v2089_v44, %v1961_v60  ;;  %v940_v36 = vmul.f32 %v2089_v44, %v1968_v39 }
 0x221   :  { %967 = vst.msk [vmem:[%s2477_s2 + $0x50] sm:$0xff] %vm485_vm2, %v903_v2  ;;  %v941_v61 = vmul.f32 %v2089_v44, %v1975_v5  ;;  %v942_v60 = vmul.f32 %v2089_v44, %v1982_v54  ;;  %v943_v39 = vmul.f32 %v2089_v44, %v1989_v24  ;;  %v2576_v5 = vld [vmem:[#allocation6_spill] sm:$0xff]  ;;  %v2577_v54 = vld [vmem:[#allocation12_spill] sm:$0xff]  ;;  %v947_v7 = vmul.f32 %v2089_v44, %v2579_v40  ;;  %v2583_v2 = vld [vmem:[#allocation13_spill] sm:$0xff] }
 0x222   :  { %968 = vst.msk [vmem:[%s2477_s2 + $0x58] sm:$0xff] %vm485_vm2, %v904_v50  ;;  %v944_v19 = vmul.f32 %v2089_v44, %v2576_v5  ;;  %v945_v1 = vmul.f32 %v2089_v44, %v2577_v54  ;;  %v2578_v24 = vld [vmem:[#allocation14_spill] sm:$0xff]  ;;  %v948_v38 = vmul.f32 %v2089_v44, %v2580_v28  ;;  %v949_v51 = vmul.f32 %v2089_v44, %v2581_v41 }
 0x223   :  { %969 = vst.msk [vmem:[%s2477_s2 + $0x60] sm:$0xff] %vm485_vm2, %v905_v13  ;;  %v946_v42 = vmul.f32 %v2089_v44, %v2578_v24  ;;  %v950_v58 = vmul.f32 %v2089_v44, %v2582_v26  ;;  %v951_v50 = vmul.f32 %v2089_v44, %v2583_v2  ;;  %v2584_v13 = vld [vmem:[#allocation15_spill] sm:$0xff] }
 0x224   :  { %970 = vst.msk [vmem:[%s2477_s2 + $0x68] sm:$0xff] %vm485_vm2, %v906_v16  ;;  %v952_v16 = vmul.f32 %v2089_v44, %v2584_v13 }
 0x225   :  { %971 = vst.msk [vmem:[%s2477_s2 + $0x70] sm:$0xff] %vm485_vm2, %v907_v20  ;;  %v2585_v20 = vld [vmem:[#allocation17_spill] sm:$0xff] }
 0x226   :  { %972 = vst.msk [vmem:[%s2477_s2 + $0x78] sm:$0xff] %vm485_vm2, %v908_v23  ;;  %v953_v23 = vmul.f32 %v2089_v44, %v2585_v20 }
 0x227   :  { %973 = vst.msk [vmem:[%s2477_s2 + $0x80] sm:$0xff] %vm485_vm2, %v909_v27  ;;  %v2586_v27 = vld [vmem:[#allocation21_spill] sm:$0xff] }
 0x228   :  { %974 = vst.msk [vmem:[%s2477_s2 + $0x88] sm:$0xff] %vm485_vm2, %v910_v30  ;;  %v954_v30 = vmul.f32 %v2089_v44, %v2586_v27 }
 0x229   :  { %975 = vst.msk [vmem:[%s2477_s2 + $0x90] sm:$0xff] %vm485_vm2, %v911_v33  ;;  %v2587_v33 = vld [vmem:[#allocation22_spill] sm:$0xff] }
 0x22a   :  { %976 = vst.msk [vmem:[%s2477_s2 + $0x98] sm:$0xff] %vm485_vm2, %v912_v43  ;;  %v955_v43 = vmul.f32 %v2089_v44, %v2587_v33 }
 0x22b   :  { %977 = vst.msk [vmem:[%s2477_s2 + $0xa0] sm:$0xff] %vm485_vm2, %v913_v55  ;;  %v2588_v55 = vld [vmem:[#allocation18_spill] sm:$0xff] }
 0x22c   :  { %978 = vst.msk [vmem:[%s2477_s2 + $0xa8] sm:$0xff] %vm485_vm2, %v914_v15  ;;  %v956_v15 = vmul.f32 %v2089_v44, %v2588_v55 }
 0x22d   :  { %979 = vst.msk [vmem:[%s2477_s2 + $0xb0] sm:$0xff] %vm485_vm2, %v915_v47 }
 0x22e   :  { %980 = vst.msk [vmem:[%s2477_s2 + $0xb8] sm:$0xff] %vm485_vm2, %v916_v59 }
 0x22f   :  { %981 = vst.msk [vmem:[%s2477_s2 + $0xc0] sm:$0xff] %vm485_vm2, %v917_v63 }
 0x230   :  { %982 = vst.msk [vmem:[%s2477_s2 + $0xc8] sm:$0xff] %vm485_vm2, %v918_v3 }
 0x231   :  { %983 = vst.msk [vmem:[%s2477_s2 + $0xd0] sm:$0xff] %vm485_vm2, %v919_v8 }
 0x232   :  { %984 = vst.msk [vmem:[%s2477_s2 + $0xd8] sm:$0xff] %vm485_vm2, %v920_v17 }
 0x233   :  { %985 = vst.msk [vmem:[%s2477_s2 + $0xe0] sm:$0xff] %vm485_vm2, %v921_v21 }
 0x234   :  { %986 = vst.msk [vmem:[%s2477_s2 + $0xe8] sm:$0xff] %vm485_vm2, %v922_v25 }
 0x235   :  { %987 = vst.msk [vmem:[%s2477_s2 + $0xf0] sm:$0xff] %vm485_vm2, %v923_v29 }
 0x236   :  { %988 = vst.msk [vmem:[%s2477_s2 + $0xf8] sm:$0xff] %vm485_vm2, %v924_v6 }
 0x237   :  { %989 = vst.msk [vmem:[%s2477_s2 + $0x100] sm:$0xff] %vm485_vm2, %v925_v48 }
 0x238   :  { %990 = vst.msk [vmem:[%s2477_s2 + $0x108] sm:$0xff] %vm485_vm2, %v926_v22 }
 0x239   :  { %991 = vst.msk [vmem:[%s2477_s2 + $0x110] sm:$0xff] %vm485_vm2, %v927_v45 }
 0x23a   :  { %992 = vst.msk [vmem:[%s2477_s2 + $0x118] sm:$0xff] %vm485_vm2, %v928_v53 }
 0x23b   :  { %993 = vst.msk [vmem:[%s2477_s2 + $0x120] sm:$0xff] %vm485_vm2, %v929_v57 }
 0x23c   :  { %994 = vst.msk [vmem:[%s2477_s2 + $0x128] sm:$0xff] %vm485_vm2, %v930_v52 }
 0x23d   :  { %995 = vst.msk [vmem:[%s2477_s2 + $0x130] sm:$0xff] %vm485_vm2, %v931_v14 }
 0x23e   :  { %996 = vst.msk [vmem:[%s2477_s2 + $0x138] sm:$0xff] %vm485_vm2, %v932_v49 }
 0x23f   :  { %997 = vst.msk [vmem:[%s2477_s2 + $0x140] sm:$0xff] %vm485_vm2, %v933_v4 }
 0x240   :  { %998 = vst.msk [vmem:[%s2477_s2 + $0x148] sm:$0xff] %vm485_vm2, %v934_v32 }
 0x241   :  { %999 = vst.msk [vmem:[%s2477_s2 + $0x150] sm:$0xff] %vm485_vm2, %v935_v11 }
 0x242   :  { %1000 = vst.msk [vmem:[%s2477_s2 + $0x158] sm:$0xff] %vm485_vm2, %v936_v18 }
 0x243   :  { %1001 = vst.msk [vmem:[%s2477_s2 + $0x160] sm:$0xff] %vm485_vm2, %v937_v9 }
 0x244   :  { %1002 = vst.msk [vmem:[%s2477_s2 + $0x168] sm:$0xff] %vm485_vm2, %v938_v56 }
 0x245   :  { %1003 = vst.msk [vmem:[%s2477_s2 + $0x170] sm:$0xff] %vm485_vm2, %v939_v37 }
 0x246   :  { %1004 = vst.msk [vmem:[%s2477_s2 + $0x178] sm:$0xff] %vm485_vm2, %v940_v36 }
 0x247   :  { %1005 = vst.msk [vmem:[%s2477_s2 + $0x180] sm:$0xff] %vm485_vm2, %v941_v61 }
 0x248   :  { %1006 = vst.msk [vmem:[%s2477_s2 + $0x188] sm:$0xff] %vm485_vm2, %v942_v60 }
 0x249   :  { %1007 = vst.msk [vmem:[%s2477_s2 + $0x190] sm:$0xff] %vm485_vm2, %v943_v39 }
 0x24a   :  { %1008 = vst.msk [vmem:[%s2477_s2 + $0x198] sm:$0xff] %vm485_vm2, %v944_v19 }
 0x24b   :  { %1009 = vst.msk [vmem:[%s2477_s2 + $0x1a0] sm:$0xff] %vm485_vm2, %v945_v1 }
 0x24c   :  { %1010 = vst.msk [vmem:[%s2477_s2 + $0x1a8] sm:$0xff] %vm485_vm2, %v946_v42 }
 0x24d   :  { %1011 = vst.msk [vmem:[%s2477_s2 + $0x1b0] sm:$0xff] %vm485_vm2, %v947_v7 }
 0x24e   :  { %1012 = vst.msk [vmem:[%s2477_s2 + $0x1b8] sm:$0xff] %vm485_vm2, %v948_v38 }
 0x24f   :  { %1013 = vst.msk [vmem:[%s2477_s2 + $0x1c0] sm:$0xff] %vm485_vm2, %v949_v51 }
 0x250   :  { %1014 = vst.msk [vmem:[%s2477_s2 + $0x1c8] sm:$0xff] %vm485_vm2, %v950_v58 }
 0x251   :  { %1015 = vst.msk [vmem:[%s2477_s2 + $0x1d0] sm:$0xff] %vm485_vm2, %v951_v50 }
 0x252   :  { %1016 = vst.msk [vmem:[%s2477_s2 + $0x1d8] sm:$0xff] %vm485_vm2, %v952_v16 }
 0x253   :  { %1017 = vst.msk [vmem:[%s2477_s2 + $0x1e0] sm:$0xff] %vm485_vm2, %v953_v23 }
 0x254   :  { %1018 = vst.msk [vmem:[%s2477_s2 + $0x1e8] sm:$0xff] %vm485_vm2, %v954_v30 }
 0x255   :  { %1019 = vst.msk [vmem:[%s2477_s2 + $0x1f0] sm:$0xff] %vm485_vm2, %v955_v43 }
 0x256   :  { %1020 = vst.msk [vmem:[%s2477_s2 + $0x1f8] sm:$0xff] %vm485_vm2, %v956_v15 }

</bundles_post_ra>
